<compile_context>
chip_gen: v7x
topology: tpu7x:2x2x1
jax: 0.10.0
libtpu: 0.0.40
codegen_flags: <defaults>
</compile_context>

<pallas_src>
import math
import functools

import jax
import jax.numpy as jnp
from jax.experimental import pallas as pl
from jax.experimental.pallas import tpu as pltpu


_LANE = 128
_SUBLANE = 8
_B_RESIDENT_MAX_BYTES = 4 * 1024 * 1024   # per-buffer cap for the K-resident B operand
_VMEM_CAP_BYTES = 40 * 1024 * 1024        # stay well under v7x's 64 MiB/TC physical VMEM


def _round_up(x, m):
    return ((x + m - 1) // m) * m


def _pick_tile(dim_padded, target, quantum, min_blocks=1):
    """Largest multiple of `quantum` <= target that divides dim_padded.

    min_blocks=2 keeps at least two blocks on the axis (when it is big enough) so the
    'parallel' row axis can be sharded across v7x's two TensorCores.
    """
    if min_blocks > 1 and dim_padded >= quantum * min_blocks:
        target = min(target, dim_padded // min_blocks)
    target = max(quantum, min(target, dim_padded))
    t = (target // quantum) * quantum
    while t > quantum:
        if dim_padded % t == 0:
            return t
        t -= quantum
    return quantum


def _prep(a, rows, cols, dtype):
    """Cast + minimal zero-pad; under jit these fuse into one pass (no extra copy)."""
    a = a.astype(dtype)
    r, c = a.shape
    if (r, c) != (rows, cols):
        a = jnp.pad(a, ((0, rows - r), (0, cols - c)))
    return a


def _mm_kernel(act, tk, b_resident, single_k,
               a_ref, b_ref, bias_ref, o_ref, *acc):
    """One (i, j, k) grid step of C = act(A @ B + bias)."""
    k = pl.program_id(2)

    if b_resident:
        # B block holds the full (padded) K extent; slice the current K chunk.
        start = pl.multiple_of(k * tk, tk)
        b = b_ref[pl.ds(start, tk), :]
    else:
        b = b_ref[...]

    part = jnp.dot(a_ref[...], b, preferred_element_type=jnp.float32)

    if single_k:
        # Single reduction step: no scratch accumulator, direct fused epilogue.
        o_ref[...] = act(part + bias_ref[...]).astype(o_ref.dtype)
    else:
        acc_ref = acc[0]

        @pl.when(k == 0)
        def _init():
            acc_ref[...] = jnp.zeros_like(acc_ref)

        acc_ref[...] += part

        @pl.when(k == pl.num_programs(2) - 1)
        def _finalize():
            # Fused epilogue: bias broadcast + activation are VPU filler under the
            # MXU/DMA-bound loop; avoids an extra HBM round trip of the output.
            o_ref[...] = act(acc_ref[...] + bias_ref[...]).astype(o_ref.dtype)


def pallas_matmul(a, b, bias=None, act=lambda v: v, *,
                  tm=512, tn=256, tk=512,
                  out_dtype=None, compute_dtype=None,
                  b_resident_bytes=_B_RESIDENT_MAX_BYTES):
    """Tiled, pipelined C = act(A @ B + bias) on TPU.

    a: (M, K), b: (K, N), bias: (N,) or None.  Operands are zero-padded only to
    (8, 128) granularity; tile sizes are chosen as divisors of the padded dims.
    compute_dtype controls the streaming precision (bf16 recommended for the
    bandwidth-bound N^2 matmul); accumulation is always f32.
    """
    M, K = a.shape
    K2, N = b.shape
    assert K == K2, (a.shape, b.shape)
    out_dtype = out_dtype if out_dtype is not None else a.dtype
    compute_dtype = compute_dtype if compute_dtype is not None else a.dtype
    isz_in = jnp.dtype(compute_dtype).itemsize
    isz_out = jnp.dtype(out_dtype).itemsize

    # Minimal alignment padding.
    Mp = _round_up(M, _SUBLANE)
    Kp = _round_up(K, _LANE)
    Np = _round_up(N, _LANE)

    # Tile selection: divisors of the padded dims (no tile-induced padding of A).
    tm = _pick_tile(Mp, tm, _SUBLANE, min_blocks=2)   # keep >=2 row blocks for v7x
    tn = _pick_tile(Np, tn, _LANE)
    tk = _pick_tile(Kp, tk, _LANE)

    gm, gn, gk = Mp // tm, Np // tn, Kp // tk
    single_k = gk == 1
    # Hold B fully K-resident in VMEM when small: with gn == 1 it is DMA'd exactly once.
    b_resident = (Kp * tn * isz_in) <= b_resident_bytes

    a_p = _prep(a, Mp, Kp, compute_dtype)
    b_p = _prep(b, Kp, Np, compute_dtype)
    if bias is None:
        bias_p = jnp.zeros((1, Np), jnp.float32)
    else:
        bias_p = _prep(jnp.asarray(bias, jnp.float32).reshape(1, -1), 1, Np, jnp.float32)

    if b_resident:
        b_spec = pl.BlockSpec((Kp, tn), lambda i, j, k: (0, j))
        b_block_rows = Kp
    else:
        b_spec = pl.BlockSpec((tk, tn), lambda i, j, k: (k, j))
        b_block_rows = tk

    scratch = [] if single_k else [pltpu.VMEM((tm, tn), jnp.float32)]

    # VMEM footprint (double-buffered inputs/outputs + f32 accumulator) -> derived limit.
    vmem_bytes = (2 * (tm * tk * isz_in + b_block_rows * tn * isz_in + tm * tn * isz_out)
                  + (0 if single_k else tm * tn * 4) + 2 * Np * 4)
    vmem_limit = min(max(vmem_bytes + 4 * 1024 * 1024, 16 * 1024 * 1024), _VMEM_CAP_BYTES)
    vmem_limit = max(vmem_limit, vmem_bytes + 2 * 1024 * 1024)

    # Accurate advisory traffic: A is read gn times; resident B once (when gn == 1).
    a_bytes = gn * Mp * Kp * isz_in
    if b_resident:
        b_fetches = 1 if gn == 1 else gm * gn
        b_bytes = b_fetches * Kp * tn * isz_in
    else:
        b_bytes = gm * Kp * Np * isz_in
    cost = pl.CostEstimate(
        flops=2 * Mp * Np * Kp,
        transcendentals=0,
        bytes_accessed=int(a_bytes + b_bytes + Mp * Np * isz_out),
    )

    out_p = pl.pallas_call(
        functools.partial(_mm_kernel, act, tk, b_resident, single_k),
        out_shape=jax.ShapeDtypeStruct((Mp, Np), out_dtype),
        grid_spec=pltpu.PrefetchScalarGridSpec(
            num_scalar_prefetch=0,
            grid=(gm, gn, gk),
            in_specs=[
                pl.BlockSpec((tm, tk), lambda i, j, k: (i, k)),   # A row/reduction tile
                b_spec,                                           # B (K-resident or tiled)
                pl.BlockSpec((1, tn), lambda i, j, k: (0, j)),    # bias col tile
            ],
            out_specs=pl.BlockSpec((tm, tn), lambda i, j, k: (i, j)),
            scratch_shapes=scratch,
        ),
        compiler_params=pltpu.CompilerParams(
            # rows/cols parallel (megacore sharding on v7x), reduction arbitrary.
            dimension_semantics=("parallel", "parallel", "arbitrary"),
            vmem_limit_bytes=int(vmem_limit),
        ),
        cost_estimate=cost,
    )(a_p, b_p, bias_p)

    return out_p[:M, :N]


def graph_convolution(x, adj, weight, bias=None, act=lambda v: v,
                      compute_dtype=jnp.bfloat16, tm=512, tk=512, tn=256):
    """GCN forward: act(adj @ (x @ weight) + bias), fully on Pallas matmul kernels.

    x: (N, F_in) or (1, N, F_in); adj: (N, N); weight: (F_in, F_out); bias: (F_out,)
    or None.  Default compute_dtype=bf16 streams the bandwidth-bound adj operand at
    half the bytes (f32 accumulation & f32 epilogue); pass jnp.float32 for
    reference-exact numerics.  Wrap in jax.jit so both matmuls share one program and
    the cast+pad of adj fuses into a single pass.
    """
    # Mirror torch.squeeze(input) without the over-squeeze hazard when N==1 / F_in==1:
    # only strip leading singleton batch dims.
    while x.ndim > 2 and x.shape[0] == 1:
        x = x[0]
    assert x.ndim == 2, f"expected 2-D node features after squeeze, got {x.shape}"

    f_in, f_out = weight.shape
    out_dtype = x.dtype

    # Choose the matmul order on PADDED widths (both may pad to 128).
    f_in_p = _round_up(f_in, _LANE)
    f_out_p = _round_up(f_out, _LANE)

    kw = dict(compute_dtype=compute_dtype, tm=tm, tk=tk, tn=tn)
    if f_out_p <= f_in_p:
        # A @ (X @ W): the N^2-cost matmul runs at (padded) width F_out.
        support = pallas_matmul(x, weight, out_dtype=compute_dtype, **kw)
        out = pallas_matmul(adj, support, bias=bias, act=act, out_dtype=out_dtype, **kw)
    else:
        # (A @ X) @ W: the N^2-cost matmul runs at (padded) width F_in.
        agg = pallas_matmul(adj, x, out_dtype=compute_dtype, **kw)
        out = pallas_matmul(agg, weight, bias=bias, act=act, out_dtype=out_dtype, **kw)
    return out


def init_gcn_weight(key, in_features, out_features, dtype=jnp.float32):
    """xavier_uniform_ as in reset_parameters()."""
    bound = math.sqrt(6.0 / (in_features + out_features))
    return jax.random.uniform(
        key, (in_features, out_features), dtype=dtype, minval=-bound, maxval=bound
    )


if __name__ == "__main__":
    # Small shapes consistent with the module: N nodes = 512, F_in = 64, F_out = 32.
    N, F_IN, F_OUT = 512, 64, 32

    key = jax.random.PRNGKey(0)
    k_x, k_adj, k_w, k_b, k_w2 = jax.random.split(key, 5)

    # Mimic a (1, N, F_in) input that forward() squeezes to (N, F_in).
    x = jax.random.normal(k_x, (1, N, F_IN), dtype=jnp.float32)
    x2 = x[0]

    # Symmetric row-normalized dense adjacency (typical GCN preprocessing).
    a_raw = (jax.random.uniform(k_adj, (N, N)) < 0.1).astype(jnp.float32)
    a_sym = a_raw + a_raw.T + jnp.eye(N, dtype=jnp.float32)
    adj = a_sym / jnp.sum(a_sym, axis=1, keepdims=True)

    weight = init_gcn_weight(k_w, F_IN, F_OUT)
    bvec = jax.random.uniform(k_b, (F_OUT,), minval=-0.1, maxval=0.1)
    F_OUT2 = 160
    weight2 = init_gcn_weight(k_w2, F_IN, F_OUT2)

    hi = jax.lax.Precision.HIGHEST
    ref = jnp.matmul(adj, jnp.matmul(x2, weight, precision=hi), precision=hi)
    ref_b = jax.nn.relu(ref + bvec)
    ref2 = jnp.matmul(jnp.matmul(adj, x2, precision=hi), weight2, precision=hi)

    def close_bf16(out, reference, tol=0.05):
        err = float(jnp.max(jnp.abs(out.astype(jnp.float32) - reference)))
        scale = float(jnp.max(jnp.abs(reference)))
        return err <= tol * scale + 1e-3

    # --- exact-numerics f32 path (kernel math check, default module config) ---
    gcn_f32 = jax.jit(functools.partial(graph_convolution, compute_dtype=jnp.float32))
    out_f32 = jax.block_until_ready(gcn_f32(x, adj, weight))
    assert out_f32.shape == (N, F_OUT)
    assert jnp.allclose(out_f32, ref, atol=1e-4, rtol=1e-4)

    # --- exact-numerics f32 path, forced multi-K-step accumulator + resident-B slicing ---
    gcn_f32_multik = jax.jit(functools.partial(
        graph_convolution, compute_dtype=jnp.float32, tm=128, tk=128))
    out_mk = jax.block_until_ready(gcn_f32_multik(x, adj, weight))
    assert jnp.allclose(out_mk, ref, atol=1e-4, rtol=1e-4)

    # --- exact-numerics f32 path, streaming (non-resident) B + accumulator variant ---
    support_hi = jnp.matmul(x2, weight, precision=hi)
    out_stream = pallas_matmul(adj, support_hi, tm=128, tk=128,
                               compute_dtype=jnp.float32, out_dtype=jnp.float32,
                               b_resident_bytes=0)
    out_stream = jax.block_until_ready(out_stream)
    assert jnp.allclose(out_stream, ref, atol=1e-4, rtol=1e-4)

    # --- default fast path: bf16 streaming of adj/support, f32 accumulation ---
    gcn = jax.jit(graph_convolution)
    out = jax.block_until_ready(gcn(x, adj, weight))
    assert out.shape == (N, F_OUT)
    assert close_bf16(out, ref)

    # --- bias + relu exercise the fused epilogue (f32 tight, bf16 loose) ---
    gcn_b_f32 = jax.jit(functools.partial(
        graph_convolution, act=jax.nn.relu, compute_dtype=jnp.float32))
    out_b_f32 = jax.block_until_ready(gcn_b_f32(x, adj, weight, bvec))
    assert jnp.allclose(out_b_f32, ref_b, atol=1e-4, rtol=1e-4)

    gcn_b = jax.jit(functools.partial(graph_convolution, act=jax.nn.relu))
    out_b = jax.block_until_ready(gcn_b(x, adj, weight, bvec))
    assert close_bf16(out_b, ref_b)

    # --- F_out_pad > F_in_pad exercises the (A@X)@W order and tn=256 ---
    out2 = jax.block_until_ready(gcn_f32(x, adj, weight2))
    assert out2.shape == (N, F_OUT2)
    assert jnp.allclose(out2, ref2, atol=1e-4, rtol=1e-4)
    out2_bf16 = jax.block_until_ready(gcn(x, adj, weight2))
    assert close_bf16(out2_bf16, ref2)

    print("KERNEL_OK")
</pallas_src>

<mosaic_0001>
module attributes {stable_mosaic.version = 11 : i64} {
  func.func @_mm_kernel(%arg0: i32, %arg1: i32, %arg2: i32, %arg3: memref<256x128xf32, #tpu.memory_space<vmem>>, %arg4: memref<128x128xf32, #tpu.memory_space<vmem>>, %arg5: memref<1x128xf32, #tpu.memory_space<vmem>>, %arg6: memref<256x128xf32, #tpu.memory_space<vmem>>) attributes {dimension_semantics = [#tpu.dimension_semantics<parallel>, #tpu.dimension_semantics<parallel>, #tpu.dimension_semantics<arbitrary>], iteration_bounds = array<i64: 2, 1, 1>, scalar_prefetch = 0 : i64, scratch_operands = 0 : i64, tpu.core_type = #tpu.core_type<tc>, window_params = [{transform_indices = @transform_0, window_bounds = array<i64: 256, 128>}, {transform_indices = @transform_1, window_bounds = array<i64: 128, 128>}, {transform_indices = @transform_2, window_bounds = array<i64: 1, 128>}, {transform_indices = @transform_3, window_bounds = array<i64: 256, 128>}]} {
    %c128_i32 = arith.constant 128 : i32
    %0 = arith.muli %arg2, %c128_i32 : i32
    %1 = tpu.assume_multiple %0, 128 : i32
    %2 = arith.index_cast %1 : i32 to index
    %c0 = arith.constant 0 : index
    %3 = vector.load %arg4[%2, %c0] : memref<128x128xf32, #tpu.memory_space<vmem>>, vector<128x128xf32>
    %c0_0 = arith.constant 0 : index
    %c0_1 = arith.constant 0 : index
    %4 = vector.load %arg3[%c0_0, %c0_1] : memref<256x128xf32, #tpu.memory_space<vmem>>, vector<256x128xf32>
    %cst = arith.constant dense<0.000000e+00> : vector<256x128xf32>
    %5 = tpu.matmul %4, %3, %cst {dimension_numbers = #tpu.dot_dimension_numbers<[1], [0], [0], [1], [0, 0, 1, 1], [], []>} : vector<256x128xf32>, vector<128x128xf32>, vector<256x128xf32> -> vector<256x128xf32>
    %c0_2 = arith.constant 0 : index
    %c0_3 = arith.constant 0 : index
    %6 = vector.load %arg5[%c0_2, %c0_3] : memref<1x128xf32, #tpu.memory_space<vmem>>, vector<1x128xf32>
    %7 = vector.broadcast %6 : vector<1x128xf32> to vector<256x128xf32>
    %8 = arith.addf %5, %7 : vector<256x128xf32>
    %c0_4 = arith.constant 0 : index
    %c0_5 = arith.constant 0 : index
    %9 = vector.load %arg6[%c0_4, %c0_5] : memref<256x128xf32, #tpu.memory_space<vmem>>, vector<256x128xf32>
    tpu.vector_store %arg6[%c0_4, %c0_5], %8 {strides = array<i32>} : memref<256x128xf32, #tpu.memory_space<vmem>>, vector<256x128xf32>,
    return
  }
  func.func @transform_0(%arg0: i32, %arg1: i32, %arg2: i32) -> (i32, i32) {
    %c0_i32 = arith.constant 0 : i32
    return %arg0, %arg2 : i32, i32
  }
  func.func @transform_1(%arg0: i32, %arg1: i32, %arg2: i32) -> (i32, i32) {
    %c0_i32 = arith.constant 0 : i32
    %c0_i32_0 = arith.constant 0 : i32
    return %c0_i32, %arg1 : i32, i32
  }
  func.func @transform_2(%arg0: i32, %arg1: i32, %arg2: i32) -> (i32, i32) {
    %c0_i32 = arith.constant 0 : i32
    %c0_i32_0 = arith.constant 0 : i32
    return %c0_i32, %arg1 : i32, i32
  }
  func.func @transform_3(%arg0: i32, %arg1: i32, %arg2: i32) -> (i32, i32) {
    %c0_i32 = arith.constant 0 : i32
    return %arg0, %arg1 : i32, i32
  }
}

module attributes {stable_mosaic.version = 11 : i64} {
  func.func @_mm_kernel(%arg0: i32, %arg1: i32, %arg2: i32, %arg3: memref<256x512xf32, #tpu.memory_space<vmem>>, %arg4: memref<512x128xf32, #tpu.memory_space<vmem>>, %arg5: memref<1x128xf32, #tpu.memory_space<vmem>>, %arg6: memref<256x128xf32, #tpu.memory_space<vmem>>) attributes {dimension_semantics = [#tpu.dimension_semantics<parallel>, #tpu.dimension_semantics<parallel>, #tpu.dimension_semantics<arbitrary>], iteration_bounds = array<i64: 2, 1, 1>, scalar_prefetch = 0 : i64, scratch_operands = 0 : i64, tpu.core_type = #tpu.core_type<tc>, window_params = [{transform_indices = @transform_0, window_bounds = array<i64: 256, 512>}, {transform_indices = @transform_1, window_bounds = array<i64: 512, 128>}, {transform_indices = @transform_2, window_bounds = array<i64: 1, 128>}, {transform_indices = @transform_3, window_bounds = array<i64: 256, 128>}]} {
    %c512_i32 = arith.constant 512 : i32
    %0 = arith.muli %arg2, %c512_i32 : i32
    %1 = tpu.assume_multiple %0, 512 : i32
    %2 = arith.index_cast %1 : i32 to index
    %c0 = arith.constant 0 : index
    %3 = vector.load %arg4[%2, %c0] : memref<512x128xf32, #tpu.memory_space<vmem>>, vector<512x128xf32>
    %c0_0 = arith.constant 0 : index
    %c0_1 = arith.constant 0 : index
    %4 = vector.load %arg3[%c0_0, %c0_1] : memref<256x512xf32, #tpu.memory_space<vmem>>, vector<256x512xf32>
    %cst = arith.constant dense<0.000000e+00> : vector<256x128xf32>
    %5 = tpu.matmul %4, %3, %cst {dimension_numbers = #tpu.dot_dimension_numbers<[1], [0], [0], [1], [0, 0, 1, 1], [], []>} : vector<256x512xf32>, vector<512x128xf32>, vector<256x128xf32> -> vector<256x128xf32>
    %c0_2 = arith.constant 0 : index
    %c0_3 = arith.constant 0 : index
    %6 = vector.load %arg5[%c0_2, %c0_3] : memref<1x128xf32, #tpu.memory_space<vmem>>, vector<1x128xf32>
    %7 = vector.broadcast %6 : vector<1x128xf32> to vector<256x128xf32>
    %8 = arith.addf %5, %7 : vector<256x128xf32>
    %c0_4 = arith.constant 0 : index
    %c0_5 = arith.constant 0 : index
    %9 = vector.load %arg6[%c0_4, %c0_5] : memref<256x128xf32, #tpu.memory_space<vmem>>, vector<256x128xf32>
    tpu.vector_store %arg6[%c0_4, %c0_5], %8 {strides = array<i32>} : memref<256x128xf32, #tpu.memory_space<vmem>>, vector<256x128xf32>,
    return
  }
  func.func @transform_0(%arg0: i32, %arg1: i32, %arg2: i32) -> (i32, i32) {
    %c0_i32 = arith.constant 0 : i32
    return %arg0, %arg2 : i32, i32
  }
  func.func @transform_1(%arg0: i32, %arg1: i32, %arg2: i32) -> (i32, i32) {
    %c0_i32 = arith.constant 0 : i32
    %c0_i32_0 = arith.constant 0 : i32
    return %c0_i32, %arg1 : i32, i32
  }
  func.func @transform_2(%arg0: i32, %arg1: i32, %arg2: i32) -> (i32, i32) {
    %c0_i32 = arith.constant 0 : i32
    %c0_i32_0 = arith.constant 0 : i32
    return %c0_i32, %arg1 : i32, i32
  }
  func.func @transform_3(%arg0: i32, %arg1: i32, %arg2: i32) -> (i32, i32) {
    %c0_i32 = arith.constant 0 : i32
    return %arg0, %arg1 : i32, i32
  }
}

</mosaic_0001>

<bundles_post_ra>
// kernel: graph_convolution.2
= control target key start
LH: loop header
LB: loop body
LE: loop exit
PB: predicated region body
PF: predicated region fallthrough
CT: control target
= control target key end

     0   :  { %s925_s12 = smov 0   ;;  %s927_s13 = smov 0   ;;  %s1118_s0 = inlined_call_operand.vmem [shape: f32[512,128], index: 0, kind: input, shape index: {}]   ;;  %s1119_s1 = inlined_call_operand.vmem [shape: f32[128,128], index: 1, kind: input, shape index: {}]   ;;  %s1120_s2 = inlined_call_operand.vmem [shape: f32[1,128], index: 2, kind: input, shape index: {}]   ;;  %s1121_s3 = inlined_call_operand.vmem [shape: f32[512,128], index: 3, kind: output, shape index: {}]  }
   0x1   :  { %s929_s14 = smov 0  }
   0x2 LB: > { %s32_s15 = sadd.s32 1, %s899_s13  ;;  %p673_p0 = scmp.ge.s32.totalorder %s903_s14, 1  ;;  %s903_s14 = sphi %s929_s14, %s13_s14   ;;  %s899_s13 = sphi %s927_s13, %s1123_s13   ;;  %s895_s12 = sphi %s925_s12, %s1122_s12  }
   0x3   : > { %p34_p1 = scmp.ge.s32.totalorder %s32_s15, 2  ;;  %p181_p2 = scmp.lt.s32.totalorder %s903_s14, 3 }
   0x5   : > { %s1125_s15 = smov (%p34_p1, %s32_s15), 0  ;;  %p182_p3 = pnand %p673_p0, %p181_p2 }
   0x6   : > { %v245_v0 = vld [vmem:[%s1119_s1] sm:$0xff] (!%p182_p3)  ;;  %v246_v1 = vld [vmem:[%s1119_s1 + $0x8] sm:$0xff] (!%p182_p3)  ;;  %v247_v2 = vld [vmem:[%s1119_s1 + $0x10] sm:$0xff] (!%p182_p3)  ;;  %s674_s22 = sshll.u32 (!%p182_p3), %s895_s12, 5 }
   0x7   : > { %185 = sbr.rel (%p182_p3) target bundleno = 286 (0x11e), region = 32  ;;  %v809_v3 = vpack.c.bf16 (!%p182_p3), %v246_v1, %v245_v0  ;;  %v248_v4 = vld [vmem:[%s1119_s1 + $0x18] sm:$0xff] (!%p182_p3)  ;;  %p219_p4 = scmp.lt.s32.totalorder (!%p182_p3), %s674_s22, 63  ;;  %v249_v6 = vld [vmem:[%s1119_s1 + $0x20] sm:$0xff] (!%p182_p3)  ;;  %v250_v7 = vld [vmem:[%s1119_s1 + $0x28] sm:$0xff] (!%p182_p3) }
   0x8   : > { %v813_v5 = vpack.c.bf16 (!%p182_p3), %v248_v4, %v247_v2  ;;  %v817_v8 = vpack.c.bf16 (!%p182_p3), %v250_v7, %v249_v6  ;;  %v251_v9 = vld [vmem:[%s1119_s1 + $0x30] sm:$0xff] (!%p182_p3)  ;;  %v252_v10 = vld [vmem:[%s1119_s1 + $0x38] sm:$0xff] (!%p182_p3)  ;;  %v253_v14 = vld [vmem:[%s1119_s1 + $0x40] sm:$0xff] (!%p182_p3) }
   0x9   : > { %810 = vmatprep.subr.bf16.mxu0 (!%p182_p3), %v809_v3  ;;  %841 = vmatprep.subr.bf16.mxu1 (!%p182_p3), %v809_v3  ;;  %v821_v13 = vpack.c.bf16 (!%p182_p3), %v252_v10, %v251_v9  ;;  %v254_v15 = vld [vmem:[%s1119_s1 + $0x48] sm:$0xff] (!%p182_p3)  ;;  %v255_v17 = vld [vmem:[%s1119_s1 + $0x50] sm:$0xff] (!%p182_p3)  ;;  %v256_v18 = vld [vmem:[%s1119_s1 + $0x58] sm:$0xff] (!%p182_p3) }
   0xa   : > { %812 = vmatpush3.bf16.msra.mxu0 (!%p182_p3), %v809_v3  ;;  %849 = vmatpush3.bf16.msra.mxu1 (!%p182_p3), %v809_v3  ;;  %v825_v16 = vpack.c.bf16 (!%p182_p3), %v254_v15, %v253_v14  ;;  %v829_v19 = vpack.c.bf16 (!%p182_p3), %v256_v18, %v255_v17  ;;  %v257_v20 = vld [vmem:[%s1119_s1 + $0x60] sm:$0xff] (!%p182_p3)  ;;  %v258_v21 = vld [vmem:[%s1119_s1 + $0x68] sm:$0xff] (!%p182_p3)  ;;  %v259_v23 = vld [vmem:[%s1119_s1 + $0x70] sm:$0xff] (!%p182_p3) }
   0xb   : > { %814 = vmatprep.subr.bf16.mxu0 (!%p182_p3), %v813_v5  ;;  %842 = vmatprep.subr.bf16.mxu1 (!%p182_p3), %v813_v5  ;;  %v833_v22 = vpack.c.bf16 (!%p182_p3), %v258_v21, %v257_v20  ;;  %v260_v24 = vld [vmem:[%s1119_s1 + $0x78] sm:$0xff] (!%p182_p3)  ;;  %v1036_v56 = vld [vmem:[%s1120_s2] ss:$0 sm:$0xff] (!%p182_p3) }
   0xc   : > { %v837_v25 = vpack.c.bf16 (!%p182_p3), %v260_v24, %v259_v23 }
   0xe   : > { %s1127_s22 = smov (!%p219_p4, %s674_s22), 63  ;;  %816 = vmatpush3.bf16.msra.mxu0 %v813_v5  ;;  %850 = vmatpush3.bf16.msra.mxu1 %v813_v5 }
   0xf   : > { %s675_s29 = sshll.u32 %s1127_s22, 3  ;;  %818 = vmatprep.subr.bf16.mxu0 %v817_v8  ;;  %843 = vmatprep.subr.bf16.mxu1 %v817_v8 }
  0x10   : > { %s975_s9 = scalar_lea.vmem %s1118_s0, %s675_s29  ;;  %s1043_s8 = scalar_lea.vmem %s1121_s3, %s675_s29 }
  0x11   : > { %v261_v11 = vld [vmem:[%s975_s9] sm:$0xff]  ;;  %v262_v26 = vld [vmem:[%s975_s9 + $0x8] sm:$0xff]  ;;  %v263_v28 = vld [vmem:[%s975_s9 + $0x10] sm:$0xff] }
  0x12   : > { %v277_v12 = vld [vmem:[%s975_s9 + $0x80] sm:$0xff]  ;;  %761 = vmatprep.mubr.f32.mxu0 %v261_v11  ;;  %820 = vmatpush3.bf16.msra.mxu0 %v817_v8  ;;  %v278_v27 = vld [vmem:[%s975_s9 + $0x88] sm:$0xff]  ;;  %v279_v29 = vld [vmem:[%s975_s9 + $0x90] sm:$0xff] }
  0x13   : > { %785 = vmatprep.mubr.f32.mxu1 %v277_v12  ;;  %851 = vmatpush3.bf16.msra.mxu1 %v817_v8  ;;  %v264_v30 = vld [vmem:[%s975_s9 + $0x18] sm:$0xff]  ;;  %v265_v32 = vld [vmem:[%s975_s9 + $0x20] sm:$0xff]  ;;  %v266_v34 = vld [vmem:[%s975_s9 + $0x28] sm:$0xff] }
  0x14   : > { %822 = vmatprep.subr.bf16.mxu0 %v821_v13  ;;  %844 = vmatprep.subr.bf16.mxu1 %v821_v13  ;;  %v280_v31 = vld [vmem:[%s975_s9 + $0x98] sm:$0xff]  ;;  %v281_v33 = vld [vmem:[%s975_s9 + $0xa0] sm:$0xff]  ;;  %v282_v35 = vld [vmem:[%s975_s9 + $0xa8] sm:$0xff] }
  0x15   : > { %v267_v36 = vld [vmem:[%s975_s9 + $0x30] sm:$0xff]  ;;  %v268_v38 = vld [vmem:[%s975_s9 + $0x38] sm:$0xff]  ;;  %v269_v40 = vld [vmem:[%s975_s9 + $0x40] sm:$0xff] }
  0x16   : > { %824 = vmatpush3.bf16.msra.mxu0 %v821_v13  ;;  %v283_v37 = vld [vmem:[%s975_s9 + $0xb0] sm:$0xff]  ;;  %v284_v39 = vld [vmem:[%s975_s9 + $0xb8] sm:$0xff]  ;;  %v285_v41 = vld [vmem:[%s975_s9 + $0xc0] sm:$0xff] }
  0x17   : > { %852 = vmatpush3.bf16.msra.mxu1 %v821_v13  ;;  %826 = vmatprep.subr.bf16.mxu0 %v825_v16  ;;  %v270_v42 = vld [vmem:[%s975_s9 + $0x48] sm:$0xff]  ;;  %v271_v44 = vld [vmem:[%s975_s9 + $0x50] sm:$0xff]  ;;  %v272_v46 = vld [vmem:[%s975_s9 + $0x58] sm:$0xff] }
  0x18   : > { %845 = vmatprep.subr.bf16.mxu1 %v825_v16  ;;  %v286_v43 = vld [vmem:[%s975_s9 + $0xc8] sm:$0xff]  ;;  %v287_v45 = vld [vmem:[%s975_s9 + $0xd0] sm:$0xff]  ;;  %v288_v47 = vld [vmem:[%s975_s9 + $0xd8] sm:$0xff] }
  0x19   : > { %v273_v48 = vld [vmem:[%s975_s9 + $0x60] sm:$0xff]  ;;  %v274_v50 = vld [vmem:[%s975_s9 + $0x68] sm:$0xff]  ;;  %v275_v52 = vld [vmem:[%s975_s9 + $0x70] sm:$0xff] }
  0x1a   : > { %828 = vmatpush3.bf16.msra.mxu0 %v825_v16  ;;  %v289_v49 = vld [vmem:[%s975_s9 + $0xe0] sm:$0xff]  ;;  %v290_v51 = vld [vmem:[%s975_s9 + $0xe8] sm:$0xff]  ;;  %v291_v53 = vld [vmem:[%s975_s9 + $0xf0] sm:$0xff] }
  0x1b   : > { %853 = vmatpush3.bf16.msra.mxu1 %v825_v16  ;;  %830 = vmatprep.subr.bf16.mxu0 %v829_v19  ;;  %v276_v54 = vld [vmem:[%s975_s9 + $0x78] sm:$0xff] }
  0x1c   : > { %846 = vmatprep.subr.bf16.mxu1 %v829_v19  ;;  %v292_v55 = vld [vmem:[%s975_s9 + $0xf8] sm:$0xff] }
  0x1e   : > { %832 = vmatpush3.bf16.msra.mxu0 %v829_v19 }
  0x1f   : > { %854 = vmatpush3.bf16.msra.mxu1 %v829_v19  ;;  %834 = vmatprep.subr.bf16.mxu0 %v833_v22 }
  0x20   : > { %847 = vmatprep.subr.bf16.mxu1 %v833_v22 }
  0x22   : > { %836 = vmatpush3.bf16.msra.mxu0 %v833_v22 }
  0x23   : > { %855 = vmatpush3.bf16.msra.mxu1 %v833_v22  ;;  %838 = vmatprep.subr.bf16.mxu0 %v837_v25 }
  0x24   : > { %848 = vmatprep.subr.bf16.mxu1 %v837_v25 }
  0x26   : > { %840 = vmatpush3.bf16.msra.mxu0 %v837_v25 }
  0x27   : > { %856 = vmatpush3.bf16.msra.mxu1 %v837_v25 }
  0x29   : > { %762 = vmatmul.mubr.f32.vlgmr.msra.gmra.mrb[0].mxu0 %v262_v26 }
  0x2a   : > { %786 = vmatmul.mubr.f32.vlgmr.msra.gmra.mrb[0].mxu1 %v278_v27  ;;  %764 = vmatprep.mubr.f32.mxu0 %v263_v28 }
  0x2b   : > { %788 = vmatprep.mubr.f32.mxu1 %v279_v29 }
  0x2d   : > { %765 = vmatmul.mubr.f32.gmra.mrb[2].mxu0 %v264_v30 }
  0x2e   : > { %789 = vmatmul.mubr.f32.gmra.mrb[2].mxu1 %v280_v31  ;;  %767 = vmatprep.mubr.f32.mxu0 %v265_v32 }
  0x2f   : > { %791 = vmatprep.mubr.f32.mxu1 %v281_v33 }
  0x31   : > { %768 = vmatmul.mubr.f32.gmra.mrb[4].mxu0 %v266_v34 }
  0x32   : > { %792 = vmatmul.mubr.f32.gmra.mrb[4].mxu1 %v282_v35  ;;  %770 = vmatprep.mubr.f32.mxu0 %v267_v36 }
  0x33   : > { %794 = vmatprep.mubr.f32.mxu1 %v283_v37 }
  0x35   : > { %771 = vmatmul.mubr.f32.gmra.mrb[6].mxu0 %v268_v38 }
  0x36   : > { %795 = vmatmul.mubr.f32.gmra.mrb[6].mxu1 %v284_v39  ;;  %773 = vmatprep.mubr.f32.mxu0 %v269_v40 }
  0x37   : > { %797 = vmatprep.mubr.f32.mxu1 %v285_v41 }
  0x39   : > { %774 = vmatmul.mubr.f32.gmra.mrb[8].mxu0 %v270_v42 }
  0x3a   : > { %798 = vmatmul.mubr.f32.gmra.mrb[8].mxu1 %v286_v43  ;;  %776 = vmatprep.mubr.f32.mxu0 %v271_v44 }
  0x3b   : > { %800 = vmatprep.mubr.f32.mxu1 %v287_v45 }
  0x3d   : > { %777 = vmatmul.mubr.f32.gmra.mrb[10].mxu0 %v272_v46 }
  0x3e   : > { %801 = vmatmul.mubr.f32.gmra.mrb[10].mxu1 %v288_v47  ;;  %779 = vmatprep.mubr.f32.mxu0 %v273_v48 }
  0x3f   : > { %803 = vmatprep.mubr.f32.mxu1 %v289_v49 }
  0x41   : > { %780 = vmatmul.mubr.f32.gmra.mrb[12].mxu0 %v274_v50 }
  0x42   : > { %804 = vmatmul.mubr.f32.gmra.mrb[12].mxu1 %v290_v51  ;;  %782 = vmatprep.mubr.f32.mxu0 %v275_v52 }
  0x43   : > { %806 = vmatprep.mubr.f32.mxu1 %v291_v53 }
  0x45   : > { %783 = vmatmul.mubr.f32.gmra.mrb[14].mxu0 %v276_v54 }
  0x46   : > { %807 = vmatmul.mubr.f32.gmra.mrb[14].mxu1 %v292_v55 }
  0xfc   : > { %v763_v57 = vpop.f32.mrb[0].mxu0 }
  0xfd   : > { %v787_v58 = vpop.f32.mrb[0].mxu1  ;;  %v372_v59 = vadd.f32 %v763_v57, %v1036_v56  ;;  %v366_v61 = vpop.f32.mrb[1].mxu0 }
  0xfe   : > { %v452_v60 = vadd.f32 %v787_v58, %v1036_v56  ;;  %v446_v62 = vpop.f32.mrb[1].mxu1  ;;  %v367_v63 = vadd.f32 %v1036_v56, %v366_v61 }
  0xff   : > { %v447_v0 = vadd.f32 %v1036_v56, %v446_v62  ;;  %526 = vst [vmem:[%s1043_s8 + $0x8] sm:$0xff] %v372_v59 }
 0x100   : > { %542 = vst [vmem:[%s1043_s8 + $0x88] sm:$0xff] %v452_v60  ;;  %525 = vst [vmem:[%s1043_s8] sm:$0xff] %v367_v63  ;;  %v766_v1 = vpop.f32.mrb[2].mxu0 }
 0x101   : > { %541 = vst [vmem:[%s1043_s8 + $0x80] sm:$0xff] %v447_v0  ;;  %v790_v2 = vpop.f32.mrb[2].mxu1  ;;  %v382_v3 = vadd.f32 %v766_v1, %v1036_v56  ;;  %v376_v5 = vpop.f32.mrb[3].mxu0 }
 0x102   : > { %v462_v4 = vadd.f32 %v790_v2, %v1036_v56  ;;  %v456_v6 = vpop.f32.mrb[3].mxu1  ;;  %v377_v7 = vadd.f32 %v1036_v56, %v376_v5 }
 0x103   : > { %v457_v8 = vadd.f32 %v1036_v56, %v456_v6  ;;  %528 = vst [vmem:[%s1043_s8 + $0x18] sm:$0xff] %v382_v3 }
 0x104   : > { %544 = vst [vmem:[%s1043_s8 + $0x98] sm:$0xff] %v462_v4  ;;  %527 = vst [vmem:[%s1043_s8 + $0x10] sm:$0xff] %v377_v7  ;;  %v769_v9 = vpop.f32.mrb[4].mxu0 }
 0x105   : > { %543 = vst [vmem:[%s1043_s8 + $0x90] sm:$0xff] %v457_v8  ;;  %v793_v10 = vpop.f32.mrb[4].mxu1  ;;  %v392_v11 = vadd.f32 %v769_v9, %v1036_v56  ;;  %v386_v13 = vpop.f32.mrb[5].mxu0 }
 0x106   : > { %v472_v12 = vadd.f32 %v793_v10, %v1036_v56  ;;  %v466_v14 = vpop.f32.mrb[5].mxu1  ;;  %v387_v15 = vadd.f32 %v1036_v56, %v386_v13 }
 0x107   : > { %v467_v16 = vadd.f32 %v1036_v56, %v466_v14  ;;  %530 = vst [vmem:[%s1043_s8 + $0x28] sm:$0xff] %v392_v11 }
 0x108   : > { %546 = vst [vmem:[%s1043_s8 + $0xa8] sm:$0xff] %v472_v12  ;;  %529 = vst [vmem:[%s1043_s8 + $0x20] sm:$0xff] %v387_v15  ;;  %v772_v17 = vpop.f32.mrb[6].mxu0 }
 0x109   : > { %545 = vst [vmem:[%s1043_s8 + $0xa0] sm:$0xff] %v467_v16  ;;  %v796_v18 = vpop.f32.mrb[6].mxu1  ;;  %v402_v19 = vadd.f32 %v772_v17, %v1036_v56  ;;  %v396_v21 = vpop.f32.mrb[7].mxu0 }
 0x10a   : > { %v482_v20 = vadd.f32 %v796_v18, %v1036_v56  ;;  %v476_v22 = vpop.f32.mrb[7].mxu1  ;;  %v397_v23 = vadd.f32 %v1036_v56, %v396_v21 }
 0x10b   : > { %v477_v24 = vadd.f32 %v1036_v56, %v476_v22  ;;  %532 = vst [vmem:[%s1043_s8 + $0x38] sm:$0xff] %v402_v19 }
 0x10c   : > { %548 = vst [vmem:[%s1043_s8 + $0xb8] sm:$0xff] %v482_v20  ;;  %531 = vst [vmem:[%s1043_s8 + $0x30] sm:$0xff] %v397_v23  ;;  %v775_v25 = vpop.f32.mrb[8].mxu0 }
 0x10d   : > { %547 = vst [vmem:[%s1043_s8 + $0xb0] sm:$0xff] %v477_v24  ;;  %v799_v26 = vpop.f32.mrb[8].mxu1  ;;  %v412_v27 = vadd.f32 %v775_v25, %v1036_v56  ;;  %v406_v29 = vpop.f32.mrb[9].mxu0 }
 0x10e   : > { %v492_v28 = vadd.f32 %v799_v26, %v1036_v56  ;;  %v486_v30 = vpop.f32.mrb[9].mxu1  ;;  %v407_v31 = vadd.f32 %v1036_v56, %v406_v29 }
 0x10f   : > { %v487_v32 = vadd.f32 %v1036_v56, %v486_v30  ;;  %534 = vst [vmem:[%s1043_s8 + $0x48] sm:$0xff] %v412_v27 }
 0x110   : > { %550 = vst [vmem:[%s1043_s8 + $0xc8] sm:$0xff] %v492_v28  ;;  %533 = vst [vmem:[%s1043_s8 + $0x40] sm:$0xff] %v407_v31  ;;  %v778_v33 = vpop.f32.mrb[10].mxu0 }
 0x111   : > { %549 = vst [vmem:[%s1043_s8 + $0xc0] sm:$0xff] %v487_v32  ;;  %v802_v34 = vpop.f32.mrb[10].mxu1  ;;  %v422_v35 = vadd.f32 %v778_v33, %v1036_v56  ;;  %v416_v37 = vpop.f32.mrb[11].mxu0 }
 0x112   : > { %v502_v36 = vadd.f32 %v802_v34, %v1036_v56  ;;  %v496_v38 = vpop.f32.mrb[11].mxu1  ;;  %v417_v39 = vadd.f32 %v1036_v56, %v416_v37 }
 0x113   : > { %v497_v40 = vadd.f32 %v1036_v56, %v496_v38  ;;  %536 = vst [vmem:[%s1043_s8 + $0x58] sm:$0xff] %v422_v35 }
 0x114   : > { %552 = vst [vmem:[%s1043_s8 + $0xd8] sm:$0xff] %v502_v36  ;;  %535 = vst [vmem:[%s1043_s8 + $0x50] sm:$0xff] %v417_v39  ;;  %v781_v41 = vpop.f32.mrb[12].mxu0 }
 0x115   : > { %551 = vst [vmem:[%s1043_s8 + $0xd0] sm:$0xff] %v497_v40  ;;  %v805_v42 = vpop.f32.mrb[12].mxu1  ;;  %v432_v43 = vadd.f32 %v781_v41, %v1036_v56  ;;  %v426_v45 = vpop.f32.mrb[13].mxu0 }
 0x116   : > { %v512_v44 = vadd.f32 %v805_v42, %v1036_v56  ;;  %v506_v46 = vpop.f32.mrb[13].mxu1  ;;  %v427_v47 = vadd.f32 %v1036_v56, %v426_v45 }
 0x117   : > { %v507_v48 = vadd.f32 %v1036_v56, %v506_v46  ;;  %538 = vst [vmem:[%s1043_s8 + $0x68] sm:$0xff] %v432_v43 }
 0x118   : > { %554 = vst [vmem:[%s1043_s8 + $0xe8] sm:$0xff] %v512_v44  ;;  %537 = vst [vmem:[%s1043_s8 + $0x60] sm:$0xff] %v427_v47  ;;  %v784_v49 = vpop.f32.mrb[14].mxu0 }
 0x119   : > { %553 = vst [vmem:[%s1043_s8 + $0xe0] sm:$0xff] %v507_v48  ;;  %v808_v50 = vpop.f32.mrb[14].mxu1  ;;  %v442_v51 = vadd.f32 %v784_v49, %v1036_v56  ;;  %v436_v53 = vpop.f32.mrb[15].mxu0 }
 0x11a   : > { %v522_v52 = vadd.f32 %v808_v50, %v1036_v56  ;;  %v516_v54 = vpop.f32.mrb[15].mxu1  ;;  %v437_v55 = vadd.f32 %v1036_v56, %v436_v53 }
 0x11b   : > { %v517_v57 = vadd.f32 %v1036_v56, %v516_v54  ;;  %540 = vst [vmem:[%s1043_s8 + $0x78] sm:$0xff] %v442_v51 }
 0x11c   : > { %556 = vst [vmem:[%s1043_s8 + $0xf8] sm:$0xff] %v522_v52  ;;  %539 = vst [vmem:[%s1043_s8 + $0x70] sm:$0xff] %v437_v55 }
 0x11d   : > { %555 = vst [vmem:[%s1043_s8 + $0xf0] sm:$0xff] %v517_v57 }
 0x11e PF: > { %s13_s14 = sadd.s32 1, %s903_s14   ;;  %s1122_s12 = smov %s899_s13 }
 0x11f   : > { %p10_p5 = scmp.ge.s32.totalorder %s13_s14, 4   ;;  %s1123_s13 = smov %s1125_s15 }
 0x121   :  { %12 = sbr.rel (!%p10_p5) target bundleno = 2 (0x2), region = 69 }

// kernel: graph_convolution.3
= control target key start
LH: loop header
LB: loop body
LE: loop exit
PB: predicated region body
PF: predicated region fallthrough
CT: control target
= control target key end

     0   :  { %s1293_s12 = smov 0   ;;  %s1295_s13 = smov 0   ;;  %s1758_s0 = inlined_call_operand.vmem [shape: f32[512,512], index: 0, kind: input, shape index: {}]   ;;  %s1759_s1 = inlined_call_operand.vmem [shape: f32[512,128], index: 1, kind: input, shape index: {}]   ;;  %s1760_s2 = inlined_call_operand.vmem [shape: f32[1,128], index: 2, kind: input, shape index: {}]   ;;  %s1761_s3 = inlined_call_operand.vmem [shape: f32[512,128], index: 3, kind: output, shape index: {}]  }
   0x1   :  { %s1297_s14 = smov 0  }
   0x2 LB: > { %s32_s15 = sadd.s32 1, %s1266_s13  ;;  %p1053_p0 = scmp.ge.s32.totalorder %s1270_s14, 1  ;;  %s1270_s14 = sphi %s1297_s14, %s13_s14   ;;  %s1266_s13 = sphi %s1295_s13, %s1763_s13   ;;  %s1262_s12 = sphi %s1293_s12, %s1762_s12  }
   0x3   : > { %p34_p1 = scmp.ge.s32.totalorder %s32_s15, 2  ;;  %p184_p2 = scmp.lt.s32.totalorder %s1270_s14, 3 }
   0x5   : > { %s1765_s15 = smov (%p34_p1, %s32_s15), 0  ;;  %p185_p3 = pnand %p1053_p0, %p184_p2 }
   0x6   : > { %v253_v0 = vld [vmem:[%s1759_s1] sm:$0xff] (!%p185_p3)  ;;  %v254_v1 = vld [vmem:[%s1759_s1 + $0x8] sm:$0xff] (!%p185_p3)  ;;  %v1272_v3 = vmov (!%p185_p3), 0.0|0.0   ;;  %v255_v6 = vld [vmem:[%s1759_s1 + $0x10] sm:$0xff] (!%p185_p3)  ;;  %s1054_s9 = sshll.u32 (!%p185_p3), %s1262_s12, 5 }
   0x7   : > { %188 = sbr.rel (%p185_p3) target bundleno = 413 (0x19d), region = 32  ;;  %v285_v2 = vld [vmem:[%s1759_s1 + $0x100] sm:$0xff] (!%p185_p3)  ;;  %1063 = vmatprep.subr.bf16.mxu1 (!%p185_p3), %v1272_v3  ;;  %v1064_v4 = vpack.c.bf16 (!%p185_p3), %v254_v1, %v253_v0  ;;  %1111 = vmatprep.subr.bf16.mxu0 (!%p185_p3), %v1272_v3  ;;  %v286_v5 = vld [vmem:[%s1759_s1 + $0x108] sm:$0xff] (!%p185_p3)  ;;  %v256_v7 = vld [vmem:[%s1759_s1 + $0x18] sm:$0xff] (!%p185_p3)  ;;  %p225_p4 = scmp.lt.s32.totalorder (!%p185_p3), %s1054_s9, 63 }
   0x8   : > { %v1112_v8 = vpack.c.bf16 (!%p185_p3), %v286_v5, %v285_v2  ;;  %v287_v9 = vld [vmem:[%s1759_s1 + $0x110] sm:$0xff] (!%p185_p3)  ;;  %v288_v10 = vld [vmem:[%s1759_s1 + $0x118] sm:$0xff] (!%p185_p3)  ;;  %v1067_v11 = vpack.c.bf16 (!%p185_p3), %v256_v7, %v255_v6  ;;  %v257_v13 = vld [vmem:[%s1759_s1 + $0x20] sm:$0xff] (!%p185_p3) }
   0x9   : > { %1065 = vmatpush1.bf16.msra.mxu1 (!%p185_p3), %v1064_v4  ;;  %v1115_v12 = vpack.c.bf16 (!%p185_p3), %v288_v10, %v287_v9  ;;  %v258_v14 = vld [vmem:[%s1759_s1 + $0x28] sm:$0xff] (!%p185_p3)  ;;  %v289_v15 = vld [vmem:[%s1759_s1 + $0x120] sm:$0xff] (!%p185_p3)  ;;  %v259_v19 = vld [vmem:[%s1759_s1 + $0x30] sm:$0xff] (!%p185_p3) }
   0xa   : > { %1113 = vmatpush1.bf16.msra.mxu0 (!%p185_p3), %v1112_v8  ;;  %1066 = vmatprep.subr.bf16.mxu1 (!%p185_p3), %v1272_v3  ;;  %v290_v16 = vld [vmem:[%s1759_s1 + $0x128] sm:$0xff] (!%p185_p3)  ;;  %v1070_v17 = vpack.c.bf16 (!%p185_p3), %v258_v14, %v257_v13  ;;  %v260_v20 = vld [vmem:[%s1759_s1 + $0x38] sm:$0xff] (!%p185_p3)  ;;  %v291_v21 = vld [vmem:[%s1759_s1 + $0x130] sm:$0xff] (!%p185_p3) }
   0xb   : > { %1114 = vmatprep.subr.bf16.mxu0 (!%p185_p3), %v1272_v3  ;;  %v1118_v18 = vpack.c.bf16 (!%p185_p3), %v290_v16, %v289_v15  ;;  %v292_v22 = vld [vmem:[%s1759_s1 + $0x138] sm:$0xff] (!%p185_p3)  ;;  %v1073_v23 = vpack.c.bf16 (!%p185_p3), %v260_v20, %v259_v19  ;;  %v261_v25 = vld [vmem:[%s1759_s1 + $0x40] sm:$0xff] (!%p185_p3)  ;;  %v262_v26 = vld [vmem:[%s1759_s1 + $0x48] sm:$0xff] (!%p185_p3) }
   0xc   : > { %v1121_v24 = vpack.c.bf16 (!%p185_p3), %v292_v22, %v291_v21  ;;  %v293_v27 = vld [vmem:[%s1759_s1 + $0x140] sm:$0xff] (!%p185_p3)  ;;  %v294_v28 = vld [vmem:[%s1759_s1 + $0x148] sm:$0xff] (!%p185_p3)  ;;  %v1076_v29 = vpack.c.bf16 (!%p185_p3), %v262_v26, %v261_v25  ;;  %v263_v31 = vld [vmem:[%s1759_s1 + $0x50] sm:$0xff] (!%p185_p3) }
   0xd   : > { %1068 = vmatpush1.bf16.msra.mxu1 (!%p185_p3), %v1067_v11  ;;  %v1124_v30 = vpack.c.bf16 (!%p185_p3), %v294_v28, %v293_v27  ;;  %v264_v32 = vld [vmem:[%s1759_s1 + $0x58] sm:$0xff] (!%p185_p3)  ;;  %v295_v33 = vld [vmem:[%s1759_s1 + $0x150] sm:$0xff] (!%p185_p3)  ;;  %v265_v37 = vld [vmem:[%s1759_s1 + $0x60] sm:$0xff] (!%p185_p3) }
   0xe   : > { %1116 = vmatpush1.bf16.msra.mxu0 %v1115_v12  ;;  %1069 = vmatprep.subr.bf16.mxu1 %v1272_v3  ;;  %s1767_s9 = smov (!%p225_p4, %s1054_s9), 63  ;;  %v296_v34 = vld [vmem:[%s1759_s1 + $0x158] sm:$0xff]  ;;  %v1079_v35 = vpack.c.bf16 %v264_v32, %v263_v31  ;;  %v266_v38 = vld [vmem:[%s1759_s1 + $0x68] sm:$0xff]  ;;  %v297_v39 = vld [vmem:[%s1759_s1 + $0x160] sm:$0xff] }
   0xf   : > { %1117 = vmatprep.subr.bf16.mxu0 %v1272_v3  ;;  %s1062_s6 = sshll.u32 %s1767_s9, 5  ;;  %v1127_v36 = vpack.c.bf16 %v296_v34, %v295_v33  ;;  %v298_v40 = vld [vmem:[%s1759_s1 + $0x168] sm:$0xff]  ;;  %v1082_v43 = vpack.c.bf16 %v266_v38, %v265_v37  ;;  %v267_v45 = vld [vmem:[%s1759_s1 + $0x70] sm:$0xff]  ;;  %v268_v46 = vld [vmem:[%s1759_s1 + $0x78] sm:$0xff]  ;;  %s1058_s16 = sshll.u32 %s1767_s9, 3 }
  0x10   : > { %s1402_s21 = scalar_lea.vmem %s1758_s0, %s1062_s6  ;;  %v1130_v44 = vpack.c.bf16 %v298_v40, %v297_v39  ;;  %v299_v47 = vld [vmem:[%s1759_s1 + $0x170] sm:$0xff]  ;;  %v300_v48 = vld [vmem:[%s1759_s1 + $0x178] sm:$0xff]  ;;  %v1085_v49 = vpack.c.bf16 %v268_v46, %v267_v45  ;;  %v269_v51 = vld [vmem:[%s1759_s1 + $0x80] sm:$0xff]  ;;  %s1684_s19 = scalar_lea.vmem %s1761_s3, %s1058_s16 }
  0x11   : > { %1071 = vmatpush1.bf16.msra.mxu1 %v1070_v17  ;;  %v318_v41 = vld [vmem:[%s1402_s21 + $0x8] sm:$0xff]  ;;  %v320_v42 = vld [vmem:[%s1402_s21 + $0x18] sm:$0xff]  ;;  %v1133_v50 = vpack.c.bf16 %v300_v48, %v299_v47  ;;  %v301_v53 = vld [vmem:[%s1759_s1 + $0x180] sm:$0xff] }
  0x12   : > { %1119 = vmatpush1.bf16.msra.mxu0 %v1118_v18  ;;  %1072 = vmatprep.subr.bf16.mxu1 %v1272_v3  ;;  %v270_v52 = vld [vmem:[%s1759_s1 + $0x88] sm:$0xff]  ;;  %v271_v57 = vld [vmem:[%s1759_s1 + $0x90] sm:$0xff]  ;;  %v272_v58 = vld [vmem:[%s1759_s1 + $0x98] sm:$0xff] }
  0x13   : > { %1120 = vmatprep.subr.bf16.mxu0 %v1272_v3  ;;  %516 = vmatprep.mubr.f32.mxu1 %v318_v41  ;;  %v302_v54 = vld [vmem:[%s1759_s1 + $0x188] sm:$0xff]  ;;  %v1088_v55 = vpack.c.bf16 %v270_v52, %v269_v51  ;;  %v303_v59 = vld [vmem:[%s1759_s1 + $0x190] sm:$0xff]  ;;  %v304_v60 = vld [vmem:[%s1759_s1 + $0x198] sm:$0xff]  ;;  %v1091_v61 = vpack.c.bf16 %v272_v58, %v271_v57 }
  0x14   : > { %741 = vmatprep.mubr.f32.mxu0 %v320_v42  ;;  %v1136_v56 = vpack.c.bf16 %v302_v54, %v301_v53  ;;  %v1139_v62 = vpack.c.bf16 %v304_v60, %v303_v59  ;;  %v273_v63 = vld [vmem:[%s1759_s1 + $0xa0] sm:$0xff]  ;;  %v274_v0 = vld [vmem:[%s1759_s1 + $0xa8] sm:$0xff]  ;;  %v275_v6 = vld [vmem:[%s1759_s1 + $0xb0] sm:$0xff] }
  0x15   : > { %1074 = vmatpush1.bf16.msra.mxu1 %v1073_v23  ;;  %v305_v1 = vld [vmem:[%s1759_s1 + $0x1a0] sm:$0xff]  ;;  %v306_v2 = vld [vmem:[%s1759_s1 + $0x1a8] sm:$0xff]  ;;  %v1094_v4 = vpack.c.bf16 %v274_v0, %v273_v63  ;;  %v276_v7 = vld [vmem:[%s1759_s1 + $0xb8] sm:$0xff] }
  0x16   : > { %1122 = vmatpush1.bf16.msra.mxu0 %v1121_v24  ;;  %1075 = vmatprep.subr.bf16.mxu1 %v1272_v3  ;;  %v1142_v5 = vpack.c.bf16 %v306_v2, %v305_v1  ;;  %v307_v8 = vld [vmem:[%s1759_s1 + $0x1b0] sm:$0xff]  ;;  %v308_v9 = vld [vmem:[%s1759_s1 + $0x1b8] sm:$0xff]  ;;  %v1097_v10 = vpack.c.bf16 %v276_v7, %v275_v6  ;;  %v277_v12 = vld [vmem:[%s1759_s1 + $0xc0] sm:$0xff] }
  0x17   : > { %1123 = vmatprep.subr.bf16.mxu0 %v1272_v3  ;;  %v1145_v11 = vpack.c.bf16 %v308_v9, %v307_v8  ;;  %v278_v13 = vld [vmem:[%s1759_s1 + $0xc8] sm:$0xff]  ;;  %v309_v14 = vld [vmem:[%s1759_s1 + $0x1c0] sm:$0xff]  ;;  %v279_v18 = vld [vmem:[%s1759_s1 + $0xd0] sm:$0xff] }
  0x18   : > { %v310_v15 = vld [vmem:[%s1759_s1 + $0x1c8] sm:$0xff]  ;;  %v1100_v16 = vpack.c.bf16 %v278_v13, %v277_v12  ;;  %v280_v19 = vld [vmem:[%s1759_s1 + $0xd8] sm:$0xff]  ;;  %v311_v20 = vld [vmem:[%s1759_s1 + $0x1d0] sm:$0xff] }
  0x19   : > { %1077 = vmatpush1.bf16.msra.mxu1 %v1076_v29  ;;  %v1148_v17 = vpack.c.bf16 %v310_v15, %v309_v14  ;;  %v312_v21 = vld [vmem:[%s1759_s1 + $0x1d8] sm:$0xff]  ;;  %v1103_v22 = vpack.c.bf16 %v280_v19, %v279_v18  ;;  %v281_v24 = vld [vmem:[%s1759_s1 + $0xe0] sm:$0xff]  ;;  %v282_v25 = vld [vmem:[%s1759_s1 + $0xe8] sm:$0xff] }
  0x1a   : > { %1125 = vmatpush1.bf16.msra.mxu0 %v1124_v30  ;;  %1078 = vmatprep.subr.bf16.mxu1 %v1272_v3  ;;  %v1151_v23 = vpack.c.bf16 %v312_v21, %v311_v20  ;;  %v313_v26 = vld [vmem:[%s1759_s1 + $0x1e0] sm:$0xff]  ;;  %v314_v27 = vld [vmem:[%s1759_s1 + $0x1e8] sm:$0xff]  ;;  %v1106_v28 = vpack.c.bf16 %v282_v25, %v281_v24  ;;  %v283_v30 = vld [vmem:[%s1759_s1 + $0xf0] sm:$0xff] }
  0x1b   : > { %1126 = vmatprep.subr.bf16.mxu0 %v1272_v3  ;;  %v1154_v29 = vpack.c.bf16 %v314_v27, %v313_v26  ;;  %v284_v31 = vld [vmem:[%s1759_s1 + $0xf8] sm:$0xff]  ;;  %v315_v32 = vld [vmem:[%s1759_s1 + $0x1f0] sm:$0xff]  ;;  %v322_v38 = vld [vmem:[%s1402_s21 + $0x28] sm:$0xff] }
  0x1c   : > { %v316_v33 = vld [vmem:[%s1759_s1 + $0x1f8] sm:$0xff]  ;;  %v1109_v34 = vpack.c.bf16 %v284_v31, %v283_v30  ;;  %v319_v37 = vld [vmem:[%s1402_s21 + $0x10] sm:$0xff]  ;;  %v321_v40 = vld [vmem:[%s1402_s21 + $0x20] sm:$0xff] }
  0x1d   : > { %1080 = vmatpush1.bf16.msra.mxu1 %v1079_v35  ;;  %v1157_v35 = vpack.c.bf16 %v316_v33, %v315_v32  ;;  %v324_v39 = vld [vmem:[%s1402_s21 + $0x38] sm:$0xff]  ;;  %v323_v41 = vld [vmem:[%s1402_s21 + $0x30] sm:$0xff]  ;;  %v326_v42 = vld [vmem:[%s1402_s21 + $0x48] sm:$0xff] }
  0x1e   : > { %1128 = vmatpush1.bf16.msra.mxu0 %v1127_v36  ;;  %1081 = vmatprep.subr.bf16.mxu1 %v1272_v3  ;;  %v317_v36 = vld [vmem:[%s1402_s21] sm:$0xff]  ;;  %v330_v45 = vld [vmem:[%s1402_s21 + $0x68] sm:$0xff]  ;;  %v332_v46 = vld [vmem:[%s1402_s21 + $0x78] sm:$0xff] }
  0x1f   : > { %1129 = vmatprep.subr.bf16.mxu0 %v1272_v3  ;;  %v329_v47 = vld [vmem:[%s1402_s21 + $0x60] sm:$0xff]  ;;  %v331_v48 = vld [vmem:[%s1402_s21 + $0x70] sm:$0xff]  ;;  %v338_v53 = vld [vmem:[%s1402_s21 + $0xa8] sm:$0xff] }
  0x20   : > { %v333_v51 = vld [vmem:[%s1402_s21 + $0x80] sm:$0xff]  ;;  %v335_v52 = vld [vmem:[%s1402_s21 + $0x90] sm:$0xff]  ;;  %v340_v54 = vld [vmem:[%s1402_s21 + $0xb8] sm:$0xff] }
  0x21   : > { %1083 = vmatpush1.bf16.msra.mxu1 %v1082_v43  ;;  %v325_v43 = vld [vmem:[%s1402_s21 + $0x40] sm:$0xff]  ;;  %v342_v57 = vld [vmem:[%s1402_s21 + $0xc8] sm:$0xff]  ;;  %v344_v58 = vld [vmem:[%s1402_s21 + $0xd8] sm:$0xff] }
  0x22   : > { %1131 = vmatpush1.bf16.msra.mxu0 %v1130_v44  ;;  %1084 = vmatprep.subr.bf16.mxu1 %v1272_v3  ;;  %v327_v44 = vld [vmem:[%s1402_s21 + $0x50] sm:$0xff]  ;;  %v341_v59 = vld [vmem:[%s1402_s21 + $0xc0] sm:$0xff]  ;;  %v350_v1 = vld [vmem:[%s1402_s21 + $0x108] sm:$0xff] }
  0x23   : > { %1132 = vmatprep.subr.bf16.mxu0 %v1272_v3  ;;  %v343_v60 = vld [vmem:[%s1402_s21 + $0xd0] sm:$0xff]  ;;  %v345_v63 = vld [vmem:[%s1402_s21 + $0xe0] sm:$0xff]  ;;  %v352_v2 = vld [vmem:[%s1402_s21 + $0x118] sm:$0xff] }
  0x24   : > { %v347_v0 = vld [vmem:[%s1402_s21 + $0xf0] sm:$0xff]  ;;  %v354_v6 = vld [vmem:[%s1402_s21 + $0x128] sm:$0xff]  ;;  %v356_v7 = vld [vmem:[%s1402_s21 + $0x138] sm:$0xff] }
  0x25   : > { %1086 = vmatpush1.bf16.msra.mxu1 %v1085_v49  ;;  %v334_v49 = vld [vmem:[%s1402_s21 + $0x88] sm:$0xff]  ;;  %v353_v8 = vld [vmem:[%s1402_s21 + $0x120] sm:$0xff]  ;;  %v355_v9 = vld [vmem:[%s1402_s21 + $0x130] sm:$0xff] }
  0x26   : > { %1134 = vmatpush1.bf16.msra.mxu0 %v1133_v50  ;;  %1087 = vmatprep.subr.bf16.mxu1 %v1272_v3  ;;  %v336_v50 = vld [vmem:[%s1402_s21 + $0x98] sm:$0xff]  ;;  %v357_v12 = vld [vmem:[%s1402_s21 + $0x140] sm:$0xff]  ;;  %v359_v13 = vld [vmem:[%s1402_s21 + $0x150] sm:$0xff] }
  0x27   : > { %1135 = vmatprep.subr.bf16.mxu0 %v1272_v3  ;;  %v362_v14 = vld [vmem:[%s1402_s21 + $0x168] sm:$0xff]  ;;  %v364_v15 = vld [vmem:[%s1402_s21 + $0x178] sm:$0xff]  ;;  %v365_v20 = vld [vmem:[%s1402_s21 + $0x180] sm:$0xff] }
  0x28   : > { %v366_v18 = vld [vmem:[%s1402_s21 + $0x188] sm:$0xff]  ;;  %v368_v19 = vld [vmem:[%s1402_s21 + $0x198] sm:$0xff]  ;;  %v367_v21 = vld [vmem:[%s1402_s21 + $0x190] sm:$0xff] }
  0x29   : > { %1089 = vmatpush1.bf16.msra.mxu1 %v1088_v55  ;;  %v337_v55 = vld [vmem:[%s1402_s21 + $0xa0] sm:$0xff]  ;;  %v371_v25 = vld [vmem:[%s1402_s21 + $0x1b0] sm:$0xff]  ;;  %v374_v26 = vld [vmem:[%s1402_s21 + $0x1c8] sm:$0xff] }
  0x2a   : > { %1137 = vmatpush1.bf16.msra.mxu0 %v1136_v56  ;;  %1090 = vmatprep.subr.bf16.mxu1 %v1272_v3  ;;  %v339_v56 = vld [vmem:[%s1402_s21 + $0xb0] sm:$0xff]  ;;  %v369_v24 = vld [vmem:[%s1402_s21 + $0x1a0] sm:$0xff]  ;;  %v376_v27 = vld [vmem:[%s1402_s21 + $0x1d8] sm:$0xff] }
  0x2b   : > { %1138 = vmatprep.subr.bf16.mxu0 %v1272_v3  ;;  %v378_v30 = vld [vmem:[%s1402_s21 + $0x1e8] sm:$0xff]  ;;  %v380_v31 = vld [vmem:[%s1402_s21 + $0x1f8] sm:$0xff]  ;;  %v377_v32 = vld [vmem:[%s1402_s21 + $0x1e0] sm:$0xff] }
  0x2c   : > { %v379_v33 = vld [vmem:[%s1402_s21 + $0x1f0] sm:$0xff] }
  0x2d   : > { %1092 = vmatpush1.bf16.msra.mxu1 %v1091_v61  ;;  %v346_v61 = vld [vmem:[%s1402_s21 + $0xe8] sm:$0xff] }
  0x2e   : > { %1140 = vmatpush1.bf16.msra.mxu0 %v1139_v62  ;;  %1093 = vmatprep.subr.bf16.mxu1 %v1272_v3  ;;  %v348_v62 = vld [vmem:[%s1402_s21 + $0xf8] sm:$0xff] }
  0x2f   : > { %1141 = vmatprep.subr.bf16.mxu0 %v1272_v3 }
  0x31   : > { %1095 = vmatpush1.bf16.msra.mxu1 %v1094_v4  ;;  %v349_v4 = vld [vmem:[%s1402_s21 + $0x100] sm:$0xff] }
  0x32   : > { %1143 = vmatpush1.bf16.msra.mxu0 %v1142_v5  ;;  %1096 = vmatprep.subr.bf16.mxu1 %v1272_v3  ;;  %v351_v5 = vld [vmem:[%s1402_s21 + $0x110] sm:$0xff] }
  0x33   : > { %1144 = vmatprep.subr.bf16.mxu0 %v1272_v3 }
  0x35   : > { %1098 = vmatpush1.bf16.msra.mxu1 %v1097_v10  ;;  %v358_v10 = vld [vmem:[%s1402_s21 + $0x148] sm:$0xff] }
  0x36   : > { %1146 = vmatpush1.bf16.msra.mxu0 %v1145_v11  ;;  %1099 = vmatprep.subr.bf16.mxu1 %v1272_v3  ;;  %v360_v11 = vld [vmem:[%s1402_s21 + $0x158] sm:$0xff] }
  0x37   : > { %1147 = vmatprep.subr.bf16.mxu0 %v1272_v3 }
  0x39   : > { %1101 = vmatpush1.bf16.msra.mxu1 %v1100_v16  ;;  %v361_v16 = vld [vmem:[%s1402_s21 + $0x160] sm:$0xff] }
  0x3a   : > { %1149 = vmatpush1.bf16.msra.mxu0 %v1148_v17  ;;  %1102 = vmatprep.subr.bf16.mxu1 %v1272_v3  ;;  %v363_v17 = vld [vmem:[%s1402_s21 + $0x170] sm:$0xff] }
  0x3b   : > { %1150 = vmatprep.subr.bf16.mxu0 %v1272_v3 }
  0x3d   : > { %1104 = vmatpush1.bf16.msra.mxu1 %v1103_v22  ;;  %v370_v22 = vld [vmem:[%s1402_s21 + $0x1a8] sm:$0xff] }
  0x3e   : > { %1152 = vmatpush1.bf16.msra.mxu0 %v1151_v23  ;;  %1105 = vmatprep.subr.bf16.mxu1 %v1272_v3  ;;  %v372_v23 = vld [vmem:[%s1402_s21 + $0x1b8] sm:$0xff] }
  0x3f   : > { %1153 = vmatprep.subr.bf16.mxu0 %v1272_v3 }
  0x41   : > { %1107 = vmatpush1.bf16.msra.mxu1 %v1106_v28  ;;  %v373_v28 = vld [vmem:[%s1402_s21 + $0x1c0] sm:$0xff] }
  0x42   : > { %1155 = vmatpush1.bf16.msra.mxu0 %v1154_v29  ;;  %1108 = vmatprep.subr.bf16.mxu1 %v1272_v3  ;;  %v375_v29 = vld [vmem:[%s1402_s21 + $0x1d0] sm:$0xff] }
  0x43   : > { %1156 = vmatprep.subr.bf16.mxu0 %v1272_v3  ;;  %v328_v3 = vld [vmem:[%s1402_s21 + $0x58] sm:$0xff] }
  0x45   : > { %1110 = vmatpush1.bf16.msra.mxu1 %v1109_v34  ;;  %v382_v34 = vld [vmem:[%s1402_s21 + $0x208] sm:$0xff] }
  0x46   : > { %1158 = vmatpush1.bf16.msra.mxu0 %v1157_v35  ;;  %v384_v35 = vld [vmem:[%s1402_s21 + $0x218] sm:$0xff] }
  0x48   : > { %517 = vmatmul.mubr.f32.vlgmr.msra.gmra.mrb[0].mxu1 %v317_v36  ;;  %v381_v36 = vld [vmem:[%s1402_s21 + $0x200] sm:$0xff] }
  0x49   : > { %742 = vmatmul.mubr.f32.vlgmr.msra.gmra.mrb[0].mxu0 %v319_v37  ;;  %521 = vmatprep.mubr.f32.mxu1 %v322_v38  ;;  %v383_v37 = vld [vmem:[%s1402_s21 + $0x210] sm:$0xff]  ;;  %v386_v38 = vld [vmem:[%s1402_s21 + $0x228] sm:$0xff] }
  0x4a   : > { %746 = vmatprep.mubr.f32.mxu0 %v324_v39  ;;  %v388_v39 = vld [vmem:[%s1402_s21 + $0x238] sm:$0xff] }
  0x4c   : > { %522 = vmatmul.mubr.f32.gmra.mrb[2].mxu1 %v321_v40  ;;  %v385_v40 = vld [vmem:[%s1402_s21 + $0x220] sm:$0xff] }
  0x4d   : > { %747 = vmatmul.mubr.f32.gmra.mrb[2].mxu0 %v323_v41  ;;  %526 = vmatprep.mubr.f32.mxu1 %v326_v42  ;;  %v387_v41 = vld [vmem:[%s1402_s21 + $0x230] sm:$0xff]  ;;  %v390_v42 = vld [vmem:[%s1402_s21 + $0x248] sm:$0xff] }
  0x4e   : > { %751 = vmatprep.mubr.f32.mxu0 %v328_v3  ;;  %v392_v3 = vld [vmem:[%s1402_s21 + $0x258] sm:$0xff] }
  0x50   : > { %527 = vmatmul.mubr.f32.gmra.mrb[4].mxu1 %v325_v43  ;;  %v389_v43 = vld [vmem:[%s1402_s21 + $0x240] sm:$0xff] }
  0x51   : > { %752 = vmatmul.mubr.f32.gmra.mrb[4].mxu0 %v327_v44  ;;  %531 = vmatprep.mubr.f32.mxu1 %v330_v45  ;;  %v391_v44 = vld [vmem:[%s1402_s21 + $0x250] sm:$0xff]  ;;  %v394_v45 = vld [vmem:[%s1402_s21 + $0x268] sm:$0xff] }
  0x52   : > { %756 = vmatprep.mubr.f32.mxu0 %v332_v46  ;;  %v396_v46 = vld [vmem:[%s1402_s21 + $0x278] sm:$0xff] }
  0x54   : > { %532 = vmatmul.mubr.f32.gmra.mrb[6].mxu1 %v329_v47  ;;  %v393_v47 = vld [vmem:[%s1402_s21 + $0x260] sm:$0xff] }
  0x55   : > { %757 = vmatmul.mubr.f32.gmra.mrb[6].mxu0 %v331_v48  ;;  %536 = vmatprep.mubr.f32.mxu1 %v334_v49  ;;  %v395_v48 = vld [vmem:[%s1402_s21 + $0x270] sm:$0xff]  ;;  %v398_v49 = vld [vmem:[%s1402_s21 + $0x288] sm:$0xff] }
  0x56   : > { %761 = vmatprep.mubr.f32.mxu0 %v336_v50  ;;  %v400_v50 = vld [vmem:[%s1402_s21 + $0x298] sm:$0xff] }
  0x58   : > { %537 = vmatmul.mubr.f32.gmra.mrb[8].mxu1 %v333_v51  ;;  %v397_v51 = vld [vmem:[%s1402_s21 + $0x280] sm:$0xff] }
  0x59   : > { %762 = vmatmul.mubr.f32.gmra.mrb[8].mxu0 %v335_v52  ;;  %541 = vmatprep.mubr.f32.mxu1 %v338_v53  ;;  %v399_v52 = vld [vmem:[%s1402_s21 + $0x290] sm:$0xff]  ;;  %v402_v53 = vld [vmem:[%s1402_s21 + $0x2a8] sm:$0xff] }
  0x5a   : > { %766 = vmatprep.mubr.f32.mxu0 %v340_v54  ;;  %v404_v54 = vld [vmem:[%s1402_s21 + $0x2b8] sm:$0xff] }
  0x5c   : > { %542 = vmatmul.mubr.f32.gmra.mrb[10].mxu1 %v337_v55  ;;  %v401_v55 = vld [vmem:[%s1402_s21 + $0x2a0] sm:$0xff] }
  0x5d   : > { %767 = vmatmul.mubr.f32.gmra.mrb[10].mxu0 %v339_v56  ;;  %546 = vmatprep.mubr.f32.mxu1 %v342_v57  ;;  %v403_v56 = vld [vmem:[%s1402_s21 + $0x2b0] sm:$0xff]  ;;  %v406_v57 = vld [vmem:[%s1402_s21 + $0x2c8] sm:$0xff] }
  0x5e   : > { %771 = vmatprep.mubr.f32.mxu0 %v344_v58  ;;  %v408_v58 = vld [vmem:[%s1402_s21 + $0x2d8] sm:$0xff] }
  0x60   : > { %547 = vmatmul.mubr.f32.gmra.mrb[12].mxu1 %v341_v59  ;;  %v405_v59 = vld [vmem:[%s1402_s21 + $0x2c0] sm:$0xff] }
  0x61   : > { %772 = vmatmul.mubr.f32.gmra.mrb[12].mxu0 %v343_v60  ;;  %551 = vmatprep.mubr.f32.mxu1 %v346_v61  ;;  %v407_v60 = vld [vmem:[%s1402_s21 + $0x2d0] sm:$0xff]  ;;  %v410_v61 = vld [vmem:[%s1402_s21 + $0x2e8] sm:$0xff] }
  0x62   : > { %776 = vmatprep.mubr.f32.mxu0 %v348_v62  ;;  %v412_v62 = vld [vmem:[%s1402_s21 + $0x2f8] sm:$0xff] }
  0x64   : > { %552 = vmatmul.mubr.f32.gmra.mrb[14].mxu1 %v345_v63  ;;  %v409_v63 = vld [vmem:[%s1402_s21 + $0x2e0] sm:$0xff] }
  0x65   : > { %777 = vmatmul.mubr.f32.gmra.mrb[14].mxu0 %v347_v0  ;;  %556 = vmatprep.mubr.f32.mxu1 %v350_v1  ;;  %v411_v0 = vld [vmem:[%s1402_s21 + $0x2f0] sm:$0xff]  ;;  %v414_v1 = vld [vmem:[%s1402_s21 + $0x308] sm:$0xff] }
  0x66   : > { %781 = vmatprep.mubr.f32.mxu0 %v352_v2  ;;  %v416_v2 = vld [vmem:[%s1402_s21 + $0x318] sm:$0xff] }
  0x68   : > { %557 = vmatmul.mubr.f32.gmra.mrb[16].mxu1 %v349_v4  ;;  %v413_v4 = vld [vmem:[%s1402_s21 + $0x300] sm:$0xff] }
  0x69   : > { %782 = vmatmul.mubr.f32.gmra.mrb[16].mxu0 %v351_v5  ;;  %561 = vmatprep.mubr.f32.mxu1 %v354_v6  ;;  %v415_v5 = vld [vmem:[%s1402_s21 + $0x310] sm:$0xff]  ;;  %v418_v6 = vld [vmem:[%s1402_s21 + $0x328] sm:$0xff] }
  0x6a   : > { %786 = vmatprep.mubr.f32.mxu0 %v356_v7  ;;  %v420_v7 = vld [vmem:[%s1402_s21 + $0x338] sm:$0xff] }
  0x6c   : > { %562 = vmatmul.mubr.f32.gmra.mrb[18].mxu1 %v353_v8  ;;  %v417_v8 = vld [vmem:[%s1402_s21 + $0x320] sm:$0xff] }
  0x6d   : > { %787 = vmatmul.mubr.f32.gmra.mrb[18].mxu0 %v355_v9  ;;  %566 = vmatprep.mubr.f32.mxu1 %v358_v10  ;;  %v419_v9 = vld [vmem:[%s1402_s21 + $0x330] sm:$0xff]  ;;  %v422_v10 = vld [vmem:[%s1402_s21 + $0x348] sm:$0xff] }
  0x6e   : > { %791 = vmatprep.mubr.f32.mxu0 %v360_v11  ;;  %v424_v11 = vld [vmem:[%s1402_s21 + $0x358] sm:$0xff] }
  0x70   : > { %567 = vmatmul.mubr.f32.gmra.mrb[20].mxu1 %v357_v12  ;;  %v421_v12 = vld [vmem:[%s1402_s21 + $0x340] sm:$0xff] }
  0x71   : > { %792 = vmatmul.mubr.f32.gmra.mrb[20].mxu0 %v359_v13  ;;  %571 = vmatprep.mubr.f32.mxu1 %v362_v14  ;;  %v423_v13 = vld [vmem:[%s1402_s21 + $0x350] sm:$0xff]  ;;  %v426_v14 = vld [vmem:[%s1402_s21 + $0x368] sm:$0xff] }
  0x72   : > { %796 = vmatprep.mubr.f32.mxu0 %v364_v15  ;;  %v428_v15 = vld [vmem:[%s1402_s21 + $0x378] sm:$0xff] }
  0x74   : > { %572 = vmatmul.mubr.f32.gmra.mrb[22].mxu1 %v361_v16  ;;  %v425_v16 = vld [vmem:[%s1402_s21 + $0x360] sm:$0xff] }
  0x75   : > { %797 = vmatmul.mubr.f32.gmra.mrb[22].mxu0 %v363_v17  ;;  %576 = vmatprep.mubr.f32.mxu1 %v366_v18  ;;  %v427_v17 = vld [vmem:[%s1402_s21 + $0x370] sm:$0xff]  ;;  %v430_v18 = vld [vmem:[%s1402_s21 + $0x388] sm:$0xff] }
  0x76   : > { %801 = vmatprep.mubr.f32.mxu0 %v368_v19  ;;  %v432_v19 = vld [vmem:[%s1402_s21 + $0x398] sm:$0xff] }
  0x78   : > { %577 = vmatmul.mubr.f32.gmra.mrb[24].mxu1 %v365_v20  ;;  %v429_v20 = vld [vmem:[%s1402_s21 + $0x380] sm:$0xff] }
  0x79   : > { %802 = vmatmul.mubr.f32.gmra.mrb[24].mxu0 %v367_v21  ;;  %581 = vmatprep.mubr.f32.mxu1 %v370_v22  ;;  %v431_v21 = vld [vmem:[%s1402_s21 + $0x390] sm:$0xff]  ;;  %v434_v22 = vld [vmem:[%s1402_s21 + $0x3a8] sm:$0xff] }
  0x7a   : > { %806 = vmatprep.mubr.f32.mxu0 %v372_v23  ;;  %v436_v23 = vld [vmem:[%s1402_s21 + $0x3b8] sm:$0xff] }
  0x7c   : > { %582 = vmatmul.mubr.f32.gmra.mrb[26].mxu1 %v369_v24  ;;  %v433_v24 = vld [vmem:[%s1402_s21 + $0x3a0] sm:$0xff] }
  0x7d   : > { %807 = vmatmul.mubr.f32.gmra.mrb[26].mxu0 %v371_v25  ;;  %586 = vmatprep.mubr.f32.mxu1 %v374_v26  ;;  %v435_v25 = vld [vmem:[%s1402_s21 + $0x3b0] sm:$0xff]  ;;  %v438_v26 = vld [vmem:[%s1402_s21 + $0x3c8] sm:$0xff] }
  0x7e   : > { %811 = vmatprep.mubr.f32.mxu0 %v376_v27  ;;  %v440_v27 = vld [vmem:[%s1402_s21 + $0x3d8] sm:$0xff] }
  0x80   : > { %587 = vmatmul.mubr.f32.gmra.mrb[28].mxu1 %v373_v28  ;;  %v437_v28 = vld [vmem:[%s1402_s21 + $0x3c0] sm:$0xff] }
  0x81   : > { %812 = vmatmul.mubr.f32.gmra.mrb[28].mxu0 %v375_v29  ;;  %591 = vmatprep.mubr.f32.mxu1 %v378_v30  ;;  %v439_v29 = vld [vmem:[%s1402_s21 + $0x3d0] sm:$0xff]  ;;  %v442_v30 = vld [vmem:[%s1402_s21 + $0x3e8] sm:$0xff] }
  0x82   : > { %816 = vmatprep.mubr.f32.mxu0 %v380_v31  ;;  %v444_v31 = vld [vmem:[%s1402_s21 + $0x3f8] sm:$0xff] }
  0x84   : > { %592 = vmatmul.mubr.f32.gmra.mrb[30].mxu1 %v377_v32  ;;  %v441_v32 = vld [vmem:[%s1402_s21 + $0x3e0] sm:$0xff] }
  0x85   : > { %817 = vmatmul.mubr.f32.gmra.mrb[30].mxu0 %v379_v33  ;;  %596 = vmatprep.mubr.f32.mxu1 %v382_v34  ;;  %v443_v33 = vld [vmem:[%s1402_s21 + $0x3f0] sm:$0xff]  ;;  %v1677_v34 = vld [vmem:[%s1760_s2] ss:$0 sm:$0xff] }
  0x86   : > { %821 = vmatprep.mubr.f32.mxu0 %v384_v35 }
  0x88   : > { %597 = vmatmul.mubr.f32.gmra.mrb[32].mxu1 %v381_v36 }
  0x89   : > { %822 = vmatmul.mubr.f32.gmra.mrb[32].mxu0 %v383_v37  ;;  %601 = vmatprep.mubr.f32.mxu1 %v386_v38 }
  0x8a   : > { %826 = vmatprep.mubr.f32.mxu0 %v388_v39 }
  0x8c   : > { %602 = vmatmul.mubr.f32.gmra.mrb[34].mxu1 %v385_v40 }
  0x8d   : > { %827 = vmatmul.mubr.f32.gmra.mrb[34].mxu0 %v387_v41  ;;  %606 = vmatprep.mubr.f32.mxu1 %v390_v42 }
  0x8e   : > { %831 = vmatprep.mubr.f32.mxu0 %v392_v3 }
  0x90   : > { %607 = vmatmul.mubr.f32.gmra.mrb[36].mxu1 %v389_v43 }
  0x91   : > { %832 = vmatmul.mubr.f32.gmra.mrb[36].mxu0 %v391_v44  ;;  %611 = vmatprep.mubr.f32.mxu1 %v394_v45 }
  0x92   : > { %836 = vmatprep.mubr.f32.mxu0 %v396_v46 }
  0x94   : > { %612 = vmatmul.mubr.f32.gmra.mrb[38].mxu1 %v393_v47 }
  0x95   : > { %837 = vmatmul.mubr.f32.gmra.mrb[38].mxu0 %v395_v48  ;;  %616 = vmatprep.mubr.f32.mxu1 %v398_v49 }
  0x96   : > { %841 = vmatprep.mubr.f32.mxu0 %v400_v50 }
  0x98   : > { %617 = vmatmul.mubr.f32.gmra.mrb[40].mxu1 %v397_v51 }
  0x99   : > { %842 = vmatmul.mubr.f32.gmra.mrb[40].mxu0 %v399_v52  ;;  %621 = vmatprep.mubr.f32.mxu1 %v402_v53 }
  0x9a   : > { %846 = vmatprep.mubr.f32.mxu0 %v404_v54 }
  0x9c   : > { %622 = vmatmul.mubr.f32.gmra.mrb[42].mxu1 %v401_v55 }
  0x9d   : > { %847 = vmatmul.mubr.f32.gmra.mrb[42].mxu0 %v403_v56  ;;  %626 = vmatprep.mubr.f32.mxu1 %v406_v57 }
  0x9e   : > { %851 = vmatprep.mubr.f32.mxu0 %v408_v58 }
  0xa0   : > { %627 = vmatmul.mubr.f32.gmra.mrb[44].mxu1 %v405_v59 }
  0xa1   : > { %852 = vmatmul.mubr.f32.gmra.mrb[44].mxu0 %v407_v60  ;;  %631 = vmatprep.mubr.f32.mxu1 %v410_v61 }
  0xa2   : > { %856 = vmatprep.mubr.f32.mxu0 %v412_v62 }
  0xa4   : > { %632 = vmatmul.mubr.f32.gmra.mrb[46].mxu1 %v409_v63 }
  0xa5   : > { %857 = vmatmul.mubr.f32.gmra.mrb[46].mxu0 %v411_v0  ;;  %636 = vmatprep.mubr.f32.mxu1 %v414_v1 }
  0xa6   : > { %861 = vmatprep.mubr.f32.mxu0 %v416_v2 }
  0xa8   : > { %637 = vmatmul.mubr.f32.gmra.mrb[48].mxu1 %v413_v4 }
  0xa9   : > { %862 = vmatmul.mubr.f32.gmra.mrb[48].mxu0 %v415_v5  ;;  %641 = vmatprep.mubr.f32.mxu1 %v418_v6 }
  0xaa   : > { %866 = vmatprep.mubr.f32.mxu0 %v420_v7 }
  0xac   : > { %642 = vmatmul.mubr.f32.gmra.mrb[50].mxu1 %v417_v8 }
  0xad   : > { %867 = vmatmul.mubr.f32.gmra.mrb[50].mxu0 %v419_v9  ;;  %646 = vmatprep.mubr.f32.mxu1 %v422_v10 }
  0xae   : > { %871 = vmatprep.mubr.f32.mxu0 %v424_v11 }
  0xb0   : > { %647 = vmatmul.mubr.f32.gmra.mrb[52].mxu1 %v421_v12 }
  0xb1   : > { %872 = vmatmul.mubr.f32.gmra.mrb[52].mxu0 %v423_v13  ;;  %651 = vmatprep.mubr.f32.mxu1 %v426_v14 }
  0xb2   : > { %876 = vmatprep.mubr.f32.mxu0 %v428_v15 }
  0xb4   : > { %652 = vmatmul.mubr.f32.gmra.mrb[54].mxu1 %v425_v16 }
  0xb5   : > { %877 = vmatmul.mubr.f32.gmra.mrb[54].mxu0 %v427_v17  ;;  %656 = vmatprep.mubr.f32.mxu1 %v430_v18 }
  0xb6   : > { %881 = vmatprep.mubr.f32.mxu0 %v432_v19 }
  0xb8   : > { %657 = vmatmul.mubr.f32.gmra.mrb[56].mxu1 %v429_v20 }
  0xb9   : > { %882 = vmatmul.mubr.f32.gmra.mrb[56].mxu0 %v431_v21  ;;  %661 = vmatprep.mubr.f32.mxu1 %v434_v22 }
  0xba   : > { %886 = vmatprep.mubr.f32.mxu0 %v436_v23 }
  0xbc   : > { %662 = vmatmul.mubr.f32.gmra.mrb[58].mxu1 %v433_v24 }
  0xbd   : > { %887 = vmatmul.mubr.f32.gmra.mrb[58].mxu0 %v435_v25  ;;  %666 = vmatprep.mubr.f32.mxu1 %v438_v26 }
  0xbe   : > { %891 = vmatprep.mubr.f32.mxu0 %v440_v27 }
  0xc0   : > { %667 = vmatmul.mubr.f32.gmra.mrb[60].mxu1 %v437_v28 }
  0xc1   : > { %892 = vmatmul.mubr.f32.gmra.mrb[60].mxu0 %v439_v29  ;;  %671 = vmatprep.mubr.f32.mxu1 %v442_v30 }
  0xc2   : > { %896 = vmatprep.mubr.f32.mxu0 %v444_v31 }
  0xc4   : > { %672 = vmatmul.mubr.f32.gmra.mrb[62].mxu1 %v441_v32 }
  0xc5   : > { %897 = vmatmul.mubr.f32.gmra.mrb[62].mxu0 %v443_v33 }
 0x11b   : > { %v518_v35 = vpop.f32.mrb[0].mxu1 }
 0x11c   : > { %v519_v36 = vadd.f32 %v1677_v34, %v518_v35  ;;  %v520_v37 = vpop.f32.mrb[1].mxu1  ;;  %v743_v38 = vpop.f32.mrb[0].mxu0 }
 0x11d   : > { %v745_v39 = vpop.f32.mrb[1].mxu0 }
 0x11e   : > { %v744_v40 = vadd.f32 %v743_v38, %v519_v36 }
 0x11f   : > { %v523_v41 = vpop.f32.mrb[2].mxu1 }
 0x120   : > { %902 = vst [vmem:[%s1684_s19] sm:$0xff] %v744_v40  ;;  %v524_v42 = vadd.f32 %v1677_v34, %v523_v41  ;;  %v525_v3 = vpop.f32.mrb[3].mxu1  ;;  %v748_v43 = vpop.f32.mrb[2].mxu0 }
 0x121   : > { %v750_v44 = vpop.f32.mrb[3].mxu0 }
 0x122   : > { %v749_v45 = vadd.f32 %v748_v43, %v524_v42 }
 0x123   : > { %v528_v46 = vpop.f32.mrb[4].mxu1 }
 0x124   : > { %903 = vst [vmem:[%s1684_s19 + $0x8] sm:$0xff] %v749_v45  ;;  %v529_v47 = vadd.f32 %v1677_v34, %v528_v46  ;;  %v530_v48 = vpop.f32.mrb[5].mxu1  ;;  %v753_v49 = vpop.f32.mrb[4].mxu0 }
 0x125   : > { %v755_v50 = vpop.f32.mrb[5].mxu0 }
 0x126   : > { %v754_v51 = vadd.f32 %v753_v49, %v529_v47 }
 0x127   : > { %v533_v52 = vpop.f32.mrb[6].mxu1 }
 0x128   : > { %904 = vst [vmem:[%s1684_s19 + $0x10] sm:$0xff] %v754_v51  ;;  %v534_v53 = vadd.f32 %v1677_v34, %v533_v52  ;;  %v535_v54 = vpop.f32.mrb[7].mxu1  ;;  %v758_v55 = vpop.f32.mrb[6].mxu0 }
 0x129   : > { %v760_v56 = vpop.f32.mrb[7].mxu0 }
 0x12a   : > { %v759_v57 = vadd.f32 %v758_v55, %v534_v53 }
 0x12b   : > { %v538_v58 = vpop.f32.mrb[8].mxu1 }
 0x12c   : > { %905 = vst [vmem:[%s1684_s19 + $0x18] sm:$0xff] %v759_v57  ;;  %v539_v59 = vadd.f32 %v1677_v34, %v538_v58  ;;  %v540_v60 = vpop.f32.mrb[9].mxu1  ;;  %v763_v61 = vpop.f32.mrb[8].mxu0 }
 0x12d   : > { %v765_v62 = vpop.f32.mrb[9].mxu0 }
 0x12e   : > { %v764_v63 = vadd.f32 %v763_v61, %v539_v59 }
 0x12f   : > { %v543_v0 = vpop.f32.mrb[10].mxu1 }
 0x130   : > { %906 = vst [vmem:[%s1684_s19 + $0x20] sm:$0xff] %v764_v63  ;;  %v544_v1 = vadd.f32 %v1677_v34, %v543_v0  ;;  %v545_v2 = vpop.f32.mrb[11].mxu1  ;;  %v768_v4 = vpop.f32.mrb[10].mxu0 }
 0x131   : > { %v770_v5 = vpop.f32.mrb[11].mxu0 }
 0x132   : > { %v769_v6 = vadd.f32 %v768_v4, %v544_v1 }
 0x133   : > { %v548_v7 = vpop.f32.mrb[12].mxu1 }
 0x134   : > { %907 = vst [vmem:[%s1684_s19 + $0x28] sm:$0xff] %v769_v6  ;;  %v549_v8 = vadd.f32 %v1677_v34, %v548_v7  ;;  %v550_v9 = vpop.f32.mrb[13].mxu1  ;;  %v773_v10 = vpop.f32.mrb[12].mxu0 }
 0x135   : > { %v775_v11 = vpop.f32.mrb[13].mxu0 }
 0x136   : > { %v774_v12 = vadd.f32 %v773_v10, %v549_v8 }
 0x137   : > { %v553_v13 = vpop.f32.mrb[14].mxu1 }
 0x138   : > { %908 = vst [vmem:[%s1684_s19 + $0x30] sm:$0xff] %v774_v12  ;;  %v554_v14 = vadd.f32 %v1677_v34, %v553_v13  ;;  %v555_v15 = vpop.f32.mrb[15].mxu1  ;;  %v778_v16 = vpop.f32.mrb[14].mxu0 }
 0x139   : > { %v780_v17 = vpop.f32.mrb[15].mxu0 }
 0x13a   : > { %v779_v18 = vadd.f32 %v778_v16, %v554_v14 }
 0x13b   : > { %v558_v19 = vpop.f32.mrb[16].mxu1 }
 0x13c   : > { %909 = vst [vmem:[%s1684_s19 + $0x38] sm:$0xff] %v779_v18  ;;  %v559_v20 = vadd.f32 %v1677_v34, %v558_v19  ;;  %v560_v21 = vpop.f32.mrb[17].mxu1  ;;  %v783_v22 = vpop.f32.mrb[16].mxu0 }
 0x13d   : > { %v785_v23 = vpop.f32.mrb[17].mxu0 }
 0x13e   : > { %v784_v24 = vadd.f32 %v783_v22, %v559_v20 }
 0x13f   : > { %v563_v25 = vpop.f32.mrb[18].mxu1 }
 0x140   : > { %910 = vst [vmem:[%s1684_s19 + $0x40] sm:$0xff] %v784_v24  ;;  %v564_v26 = vadd.f32 %v1677_v34, %v563_v25  ;;  %v565_v27 = vpop.f32.mrb[19].mxu1  ;;  %v788_v28 = vpop.f32.mrb[18].mxu0 }
 0x141   : > { %v790_v29 = vpop.f32.mrb[19].mxu0 }
 0x142   : > { %v789_v30 = vadd.f32 %v788_v28, %v564_v26 }
 0x143   : > { %v568_v31 = vpop.f32.mrb[20].mxu1 }
 0x144   : > { %911 = vst [vmem:[%s1684_s19 + $0x48] sm:$0xff] %v789_v30  ;;  %v569_v32 = vadd.f32 %v1677_v34, %v568_v31  ;;  %v570_v33 = vpop.f32.mrb[21].mxu1  ;;  %v793_v35 = vpop.f32.mrb[20].mxu0 }
 0x145   : > { %v795_v36 = vpop.f32.mrb[21].mxu0 }
 0x146   : > { %v794_v37 = vadd.f32 %v793_v35, %v569_v32 }
 0x147   : > { %v573_v38 = vpop.f32.mrb[22].mxu1 }
 0x148   : > { %912 = vst [vmem:[%s1684_s19 + $0x50] sm:$0xff] %v794_v37  ;;  %v574_v39 = vadd.f32 %v1677_v34, %v573_v38  ;;  %v575_v40 = vpop.f32.mrb[23].mxu1  ;;  %v798_v41 = vpop.f32.mrb[22].mxu0 }
 0x149   : > { %v800_v42 = vpop.f32.mrb[23].mxu0 }
 0x14a   : > { %v799_v3 = vadd.f32 %v798_v41, %v574_v39 }
 0x14b   : > { %v578_v43 = vpop.f32.mrb[24].mxu1 }
 0x14c   : > { %913 = vst [vmem:[%s1684_s19 + $0x58] sm:$0xff] %v799_v3  ;;  %v579_v44 = vadd.f32 %v1677_v34, %v578_v43  ;;  %v580_v45 = vpop.f32.mrb[25].mxu1  ;;  %v803_v46 = vpop.f32.mrb[24].mxu0 }
 0x14d   : > { %v805_v47 = vpop.f32.mrb[25].mxu0 }
 0x14e   : > { %v804_v48 = vadd.f32 %v803_v46, %v579_v44 }
 0x14f   : > { %v583_v49 = vpop.f32.mrb[26].mxu1 }
 0x150   : > { %914 = vst [vmem:[%s1684_s19 + $0x60] sm:$0xff] %v804_v48  ;;  %v584_v50 = vadd.f32 %v1677_v34, %v583_v49  ;;  %v585_v51 = vpop.f32.mrb[27].mxu1  ;;  %v808_v52 = vpop.f32.mrb[26].mxu0 }
 0x151   : > { %v810_v53 = vpop.f32.mrb[27].mxu0 }
 0x152   : > { %v809_v54 = vadd.f32 %v808_v52, %v584_v50 }
 0x153   : > { %v588_v55 = vpop.f32.mrb[28].mxu1 }
 0x154   : > { %915 = vst [vmem:[%s1684_s19 + $0x68] sm:$0xff] %v809_v54  ;;  %v589_v56 = vadd.f32 %v1677_v34, %v588_v55  ;;  %v590_v57 = vpop.f32.mrb[29].mxu1  ;;  %v813_v58 = vpop.f32.mrb[28].mxu0 }
 0x155   : > { %v815_v59 = vpop.f32.mrb[29].mxu0 }
 0x156   : > { %v814_v60 = vadd.f32 %v813_v58, %v589_v56 }
 0x157   : > { %v593_v61 = vpop.f32.mrb[30].mxu1 }
 0x158   : > { %916 = vst [vmem:[%s1684_s19 + $0x70] sm:$0xff] %v814_v60  ;;  %v594_v62 = vadd.f32 %v1677_v34, %v593_v61  ;;  %v595_v63 = vpop.f32.mrb[31].mxu1  ;;  %v818_v0 = vpop.f32.mrb[30].mxu0 }
 0x159   : > { %v820_v1 = vpop.f32.mrb[31].mxu0 }
 0x15a   : > { %v819_v2 = vadd.f32 %v818_v0, %v594_v62 }
 0x15b   : > { %v598_v4 = vpop.f32.mrb[32].mxu1 }
 0x15c   : > { %917 = vst [vmem:[%s1684_s19 + $0x78] sm:$0xff] %v819_v2  ;;  %v599_v5 = vadd.f32 %v1677_v34, %v598_v4  ;;  %v600_v6 = vpop.f32.mrb[33].mxu1  ;;  %v823_v7 = vpop.f32.mrb[32].mxu0 }
 0x15d   : > { %v825_v8 = vpop.f32.mrb[33].mxu0 }
 0x15e   : > { %v824_v9 = vadd.f32 %v823_v7, %v599_v5 }
 0x15f   : > { %v603_v10 = vpop.f32.mrb[34].mxu1 }
 0x160   : > { %918 = vst [vmem:[%s1684_s19 + $0x80] sm:$0xff] %v824_v9  ;;  %v604_v11 = vadd.f32 %v1677_v34, %v603_v10  ;;  %v605_v12 = vpop.f32.mrb[35].mxu1  ;;  %v828_v13 = vpop.f32.mrb[34].mxu0 }
 0x161   : > { %v830_v14 = vpop.f32.mrb[35].mxu0 }
 0x162   : > { %v829_v15 = vadd.f32 %v828_v13, %v604_v11 }
 0x163   : > { %v608_v16 = vpop.f32.mrb[36].mxu1 }
 0x164   : > { %919 = vst [vmem:[%s1684_s19 + $0x88] sm:$0xff] %v829_v15  ;;  %v609_v17 = vadd.f32 %v1677_v34, %v608_v16  ;;  %v610_v18 = vpop.f32.mrb[37].mxu1  ;;  %v833_v19 = vpop.f32.mrb[36].mxu0 }
 0x165   : > { %v835_v20 = vpop.f32.mrb[37].mxu0 }
 0x166   : > { %v834_v21 = vadd.f32 %v833_v19, %v609_v17 }
 0x167   : > { %v613_v22 = vpop.f32.mrb[38].mxu1 }
 0x168   : > { %920 = vst [vmem:[%s1684_s19 + $0x90] sm:$0xff] %v834_v21  ;;  %v614_v23 = vadd.f32 %v1677_v34, %v613_v22  ;;  %v615_v24 = vpop.f32.mrb[39].mxu1  ;;  %v838_v25 = vpop.f32.mrb[38].mxu0 }
 0x169   : > { %v840_v26 = vpop.f32.mrb[39].mxu0 }
 0x16a   : > { %v839_v27 = vadd.f32 %v838_v25, %v614_v23 }
 0x16b   : > { %v618_v28 = vpop.f32.mrb[40].mxu1 }
 0x16c   : > { %921 = vst [vmem:[%s1684_s19 + $0x98] sm:$0xff] %v839_v27  ;;  %v619_v29 = vadd.f32 %v1677_v34, %v618_v28  ;;  %v620_v30 = vpop.f32.mrb[41].mxu1  ;;  %v843_v31 = vpop.f32.mrb[40].mxu0 }
 0x16d   : > { %v845_v32 = vpop.f32.mrb[41].mxu0 }
 0x16e   : > { %v844_v33 = vadd.f32 %v843_v31, %v619_v29 }
 0x16f   : > { %v623_v35 = vpop.f32.mrb[42].mxu1 }
 0x170   : > { %922 = vst [vmem:[%s1684_s19 + $0xa0] sm:$0xff] %v844_v33  ;;  %v624_v36 = vadd.f32 %v1677_v34, %v623_v35  ;;  %v625_v37 = vpop.f32.mrb[43].mxu1  ;;  %v848_v38 = vpop.f32.mrb[42].mxu0 }
 0x171   : > { %v850_v39 = vpop.f32.mrb[43].mxu0 }
 0x172   : > { %v849_v40 = vadd.f32 %v848_v38, %v624_v36 }
 0x173   : > { %v628_v41 = vpop.f32.mrb[44].mxu1 }
 0x174   : > { %923 = vst [vmem:[%s1684_s19 + $0xa8] sm:$0xff] %v849_v40  ;;  %v629_v42 = vadd.f32 %v1677_v34, %v628_v41  ;;  %v630_v3 = vpop.f32.mrb[45].mxu1  ;;  %v853_v43 = vpop.f32.mrb[44].mxu0 }
 0x175   : > { %v855_v44 = vpop.f32.mrb[45].mxu0 }
 0x176   : > { %v854_v45 = vadd.f32 %v853_v43, %v629_v42 }
 0x177   : > { %v633_v46 = vpop.f32.mrb[46].mxu1 }
 0x178   : > { %924 = vst [vmem:[%s1684_s19 + $0xb0] sm:$0xff] %v854_v45  ;;  %v634_v47 = vadd.f32 %v1677_v34, %v633_v46  ;;  %v635_v48 = vpop.f32.mrb[47].mxu1  ;;  %v858_v49 = vpop.f32.mrb[46].mxu0 }
 0x179   : > { %v860_v50 = vpop.f32.mrb[47].mxu0 }
 0x17a   : > { %v859_v51 = vadd.f32 %v858_v49, %v634_v47 }
 0x17b   : > { %v638_v52 = vpop.f32.mrb[48].mxu1 }
 0x17c   : > { %925 = vst [vmem:[%s1684_s19 + $0xb8] sm:$0xff] %v859_v51  ;;  %v639_v53 = vadd.f32 %v1677_v34, %v638_v52  ;;  %v640_v54 = vpop.f32.mrb[49].mxu1  ;;  %v863_v55 = vpop.f32.mrb[48].mxu0 }
 0x17d   : > { %v865_v56 = vpop.f32.mrb[49].mxu0 }
 0x17e   : > { %v864_v57 = vadd.f32 %v863_v55, %v639_v53 }
 0x17f   : > { %v643_v58 = vpop.f32.mrb[50].mxu1 }
 0x180   : > { %926 = vst [vmem:[%s1684_s19 + $0xc0] sm:$0xff] %v864_v57  ;;  %v644_v59 = vadd.f32 %v1677_v34, %v643_v58  ;;  %v645_v60 = vpop.f32.mrb[51].mxu1  ;;  %v868_v61 = vpop.f32.mrb[50].mxu0 }
 0x181   : > { %v870_v62 = vpop.f32.mrb[51].mxu0 }
 0x182   : > { %v869_v63 = vadd.f32 %v868_v61, %v644_v59 }
 0x183   : > { %v648_v0 = vpop.f32.mrb[52].mxu1 }
 0x184   : > { %927 = vst [vmem:[%s1684_s19 + $0xc8] sm:$0xff] %v869_v63  ;;  %v649_v1 = vadd.f32 %v1677_v34, %v648_v0  ;;  %v650_v2 = vpop.f32.mrb[53].mxu1  ;;  %v873_v4 = vpop.f32.mrb[52].mxu0 }
 0x185   : > { %v875_v5 = vpop.f32.mrb[53].mxu0 }
 0x186   : > { %v874_v6 = vadd.f32 %v873_v4, %v649_v1 }
 0x187   : > { %v653_v7 = vpop.f32.mrb[54].mxu1 }
 0x188   : > { %928 = vst [vmem:[%s1684_s19 + $0xd0] sm:$0xff] %v874_v6  ;;  %v654_v8 = vadd.f32 %v1677_v34, %v653_v7  ;;  %v655_v9 = vpop.f32.mrb[55].mxu1  ;;  %v878_v10 = vpop.f32.mrb[54].mxu0 }
 0x189   : > { %v880_v11 = vpop.f32.mrb[55].mxu0 }
 0x18a   : > { %v879_v12 = vadd.f32 %v878_v10, %v654_v8 }
 0x18b   : > { %v658_v13 = vpop.f32.mrb[56].mxu1 }
 0x18c   : > { %929 = vst [vmem:[%s1684_s19 + $0xd8] sm:$0xff] %v879_v12  ;;  %v659_v14 = vadd.f32 %v1677_v34, %v658_v13  ;;  %v660_v15 = vpop.f32.mrb[57].mxu1  ;;  %v883_v16 = vpop.f32.mrb[56].mxu0 }
 0x18d   : > { %v885_v17 = vpop.f32.mrb[57].mxu0 }
 0x18e   : > { %v884_v18 = vadd.f32 %v883_v16, %v659_v14 }
 0x18f   : > { %v663_v19 = vpop.f32.mrb[58].mxu1 }
 0x190   : > { %930 = vst [vmem:[%s1684_s19 + $0xe0] sm:$0xff] %v884_v18  ;;  %v664_v20 = vadd.f32 %v1677_v34, %v663_v19  ;;  %v665_v21 = vpop.f32.mrb[59].mxu1  ;;  %v888_v22 = vpop.f32.mrb[58].mxu0 }
 0x191   : > { %v890_v23 = vpop.f32.mrb[59].mxu0 }
 0x192   : > { %v889_v24 = vadd.f32 %v888_v22, %v664_v20 }
 0x193   : > { %v668_v25 = vpop.f32.mrb[60].mxu1 }
 0x194   : > { %931 = vst [vmem:[%s1684_s19 + $0xe8] sm:$0xff] %v889_v24  ;;  %v669_v26 = vadd.f32 %v1677_v34, %v668_v25  ;;  %v670_v27 = vpop.f32.mrb[61].mxu1  ;;  %v893_v28 = vpop.f32.mrb[60].mxu0 }
 0x195   : > { %v895_v29 = vpop.f32.mrb[61].mxu0 }
 0x196   : > { %v894_v30 = vadd.f32 %v893_v28, %v669_v26 }
 0x197   : > { %v673_v31 = vpop.f32.mrb[62].mxu1 }
 0x198   : > { %932 = vst [vmem:[%s1684_s19 + $0xf0] sm:$0xff] %v894_v30  ;;  %v674_v32 = vadd.f32 %v1677_v34, %v673_v31  ;;  %v675_v33 = vpop.f32.mrb[63].mxu1  ;;  %v898_v35 = vpop.f32.mrb[62].mxu0 }
 0x199   : > { %v900_v36 = vpop.f32.mrb[63].mxu0 }
 0x19a   : > { %v899_v37 = vadd.f32 %v898_v35, %v674_v32 }
 0x19c   : > { %933 = vst [vmem:[%s1684_s19 + $0xf8] sm:$0xff] %v899_v37 }
 0x19d PF: > { %s13_s14 = sadd.s32 1, %s1270_s14   ;;  %s1762_s12 = smov %s1266_s13 }
 0x19e   : > { %p10_p5 = scmp.ge.s32.totalorder %s13_s14, 4   ;;  %s1763_s13 = smov %s1765_s15 }
 0x1a0   :  { %12 = sbr.rel (!%p10_p5) target bundleno = 2 (0x2), region = 69 }

</bundles_post_ra>
